<compile_context>
chip_gen: v6e
topology: v6e:2x2x1
jax: 0.10.0
libtpu: 0.0.40
codegen_flags: <defaults>
</compile_context>

<pallas_src>
import functools

import jax
import jax.numpy as jnp
from jax import lax
from jax.experimental import pallas as pl
from jax.experimental.pallas import tpu as pltpu


def _round_up(x, m):
    return ((x + m - 1) // m) * m


# ----------------------------------------------------------------------------
# Kernel
# ----------------------------------------------------------------------------
def _embed_concat_kernel(vids_ref, sids_ref, table_ref, out_ref, *, vocab_size):
    """One row tile: out = onehot(vocab_id, V + selector_id) @ augmented_table.

    vids_ref : (tile_n, 1) int32 vocab ids for this row tile (VMEM)
    sids_ref : (tile_n, 1) int32 selector ids for this row tile (VMEM)
    table_ref: (k_pad, d_pad) augmented embedding table, resident in VMEM
                 rows [0, V)      : node embeddings (feature cols zero-padded)
                 row  V           : selector 0 embedding (col emb_size+1 = 50)
                 row  V+1         : selector 1 embedding (col emb_size   = 50)
                 rows [V+2, k_pad): zero padding
    out_ref  : (tile_n, d_pad) output tile (cols >= emb_size+2 are zero padding)
    """
    tile_n = out_ref.shape[0]
    k_pad = table_ref.shape[0]

    col = lax.broadcasted_iota(jnp.int32, (tile_n, k_pad), 1)
    vids = vids_ref[...]                     # (tile_n, 1)
    sels = sids_ref[...] + vocab_size        # (tile_n, 1) -> rows V / V+1

    # Two disjoint 1s per row (vocab row < V, selector row >= V).
    onehot = jnp.logical_or(col == vids, col == sels).astype(table_ref.dtype)

    out_ref[...] = jnp.dot(
        onehot,
        table_ref[...],
        preferred_element_type=jnp.float32,
        precision=lax.Precision.HIGHEST,
    ).astype(out_ref.dtype)


# ----------------------------------------------------------------------------
# Wrapper
# ----------------------------------------------------------------------------
def node_embeddings_with_selectors(emb_table, vocab_ids, selector_ids, *, tile_n=None):
    """emb_table: (V, emb_size); vocab_ids/selector_ids: (N,) or (N, 1) ints.

    Returns (N, emb_size + 2) = concat(emb_table[vocab_ids], selector[selector_ids]).
    """
    vocab_ids = jnp.reshape(vocab_ids, (-1,)).astype(jnp.int32)
    selector_ids = jnp.reshape(selector_ids, (-1,)).astype(jnp.int32)
    n = vocab_ids.shape[0]
    v, emb_size = emb_table.shape
    dtype = emb_table.dtype
    itemsize = jnp.dtype(dtype).itemsize

    d_out = emb_size + 2
    d_pad = _round_up(d_out, 128)          # lane-dense output
    k_pad = _round_up(v + 2, 256)          # MXU-friendly contraction dim

    if tile_n is None:
        # Large tiles amortize per-grid-step overhead; multiple of 256 when tiled.
        tile_n = min(512, _round_up(n, 8))
    n_pad = _round_up(n, tile_n)
    grid = (n_pad // tile_n,)

    # Augmented table: node embeddings + 2 selector rows, zero-padded elsewhere.
    table_p = jnp.zeros((k_pad, d_pad), dtype)
    table_p = table_p.at[:v, :emb_size].set(emb_table)
    table_p = table_p.at[v, emb_size + 1].set(jnp.asarray(50.0, dtype))      # sel 0
    table_p = table_p.at[v + 1, emb_size].set(jnp.asarray(50.0, dtype))      # sel 1

    # Padded rows gather row 0 / selector 0 and are sliced away by the wrapper.
    vids_p = jnp.pad(vocab_ids, (0, n_pad - n)).reshape(n_pad, 1)
    sids_p = jnp.pad(selector_ids, (0, n_pad - n)).reshape(n_pad, 1)

    cost = pl.CostEstimate(
        flops=2 * n_pad * k_pad * d_pad,
        transcendentals=0,
        bytes_accessed=(k_pad * d_pad * itemsize        # resident table (read once)
                        + n_pad * d_pad * itemsize      # output
                        + n_pad * 4 * 2),               # ids
    )

    # VMEM budget: resident table (single-buffered) + double-buffered out/id tiles
    # + one-hot intermediate.  Cap below physical VMEM (v7x only has 64 MiB/TC).
    vmem_need = (k_pad * d_pad * itemsize
                 + 2 * tile_n * d_pad * itemsize
                 + 2 * 2 * tile_n * 128 * 4
                 + tile_n * k_pad * 4)
    try:
        phys_vmem = int(pltpu.get_tpu_info().vmem_capacity_bytes)
    except Exception:
        phys_vmem = 64 << 20                     # conservative (v7x per-TC VMEM)
    vmem_limit = int(min(max(vmem_need + (8 << 20), 32 << 20), (phys_vmem * 3) // 4))

    def _build_call(single_buffer_table):
        table_kwargs = {}
        if single_buffer_table:
            table_kwargs = dict(pipeline_mode=pl.Buffered(1))
        return pl.pallas_call(
            functools.partial(_embed_concat_kernel, vocab_size=v),
            out_shape=jax.ShapeDtypeStruct((n_pad, d_pad), dtype),
            grid_spec=pltpu.PrefetchScalarGridSpec(
                num_scalar_prefetch=0,
                grid=grid,
                in_specs=[
                    # Blocked ids for this row tile (VMEM, pipelined with the grid).
                    pl.BlockSpec((tile_n, 1), lambda i: (i, 0)),
                    pl.BlockSpec((tile_n, 1), lambda i: (i, 0)),
                    # Full augmented table, same block every step -> VMEM-resident.
                    pl.BlockSpec((k_pad, d_pad), lambda i: (0, 0), **table_kwargs),
                ],
                out_specs=pl.BlockSpec((tile_n, d_pad), lambda i: (i, 0)),
            ),
            compiler_params=pltpu.CompilerParams(
                dimension_semantics=("parallel",),
                vmem_limit_bytes=vmem_limit,
            ),
            cost_estimate=cost,
        )

    try:
        out = _build_call(True)(vids_p, sids_p, table_p)
    except Exception:
        # Fallback if this JAX build rejects Buffered(1) for a resident block.
        out = _build_call(False)(vids_p, sids_p, table_p)

    return out[:n, :d_out]


# ----------------------------------------------------------------------------
# Module-style wrappers (mirror the PyTorch classes)
# ----------------------------------------------------------------------------
class Config:
    def __init__(self, vocab_size, emb_size, inst2vec_embeddings='random',
                 use_selector_embeddings=True):
        self.vocab_size = vocab_size
        self.emb_size = emb_size
        self.hidden_size = emb_size + 2
        self.inst2vec_embeddings = inst2vec_embeddings
        self.use_selector_embeddings = use_selector_embeddings


class NodeEmbeddingsWithSelectors:
    """JAX/Pallas port of the PyTorch `NodeEmbeddingsWithSelectors` module."""

    def __init__(self, config, key, pretrained_embeddings=None):
        assert config.use_selector_embeddings, \
            'This Module is for use with use_selector_embeddings!'
        if config.inst2vec_embeddings == 'random':
            # nn.Embedding default init: N(0, 1)
            self.emb_table = jax.random.normal(
                key, (config.vocab_size, config.emb_size), jnp.float32)
        else:
            raise NotImplementedError(config.inst2vec_embeddings)
        self.config = config

    def __call__(self, vocab_ids, selector_ids):
        return node_embeddings_with_selectors(self.emb_table, vocab_ids, selector_ids)


# ----------------------------------------------------------------------------
# Pure-JAX reference (for correctness check only)
# ----------------------------------------------------------------------------
def _reference(emb_table, vocab_ids, selector_ids):
    vocab_ids = jnp.reshape(vocab_ids, (-1,))
    selector_ids = jnp.reshape(selector_ids, (-1,))
    selector_init = jnp.array([[0.0, 50.0], [50.0, 0.0]], emb_table.dtype)
    node = emb_table[vocab_ids]
    sel = selector_init[selector_ids]
    return jnp.concatenate([node, sel], axis=1)


if __name__ == "__main__":
    key = jax.random.PRNGKey(0)
    k_emb, k_vid, k_sid, k_emb2, k_vid2, k_sid2 = jax.random.split(key, 6)

    # ---- Case 1: hidden_size = emb_size + 2 = 32, N = 16, <N, 1> ids ----
    cfg = Config(vocab_size=64, emb_size=30)
    mod = NodeEmbeddingsWithSelectors(cfg, k_emb)
    N = 16
    vocab_ids = jax.random.randint(k_vid, (N, 1), 0, cfg.vocab_size, jnp.int32)
    selector_ids = jax.random.randint(k_sid, (N, 1), 0, 2, jnp.int32)

    out = jax.block_until_ready(mod(vocab_ids, selector_ids))
    ref = _reference(mod.emb_table, vocab_ids, selector_ids)
    assert out.shape == (N, cfg.hidden_size), out.shape
    assert jnp.allclose(out, ref, rtol=1e-5, atol=1e-5), float(jnp.abs(out - ref).max())

    # ---- Case 2: ragged N (not a tile multiple), tiny emb dim, (N, 1) ids ----
    cfg2 = Config(vocab_size=10, emb_size=14)
    mod2 = NodeEmbeddingsWithSelectors(cfg2, k_emb2)
    N2 = 12
    vocab_ids2 = jax.random.randint(k_vid2, (N2, 1), 0, cfg2.vocab_size, jnp.int32)
    selector_ids2 = jax.random.randint(k_sid2, (N2, 1), 0, 2, jnp.int32)

    out2 = jax.block_until_ready(mod2(vocab_ids2, selector_ids2))
    ref2 = _reference(mod2.emb_table, vocab_ids2, selector_ids2)
    assert out2.shape == (N2, cfg2.hidden_size), out2.shape
    assert jnp.allclose(out2, ref2, rtol=1e-5, atol=1e-5), float(jnp.abs(out2 - ref2).max())

    print("KERNEL_OK")
</pallas_src>

<mosaic_0001>
module attributes {stable_mosaic.version = 11 : i64} {
  func.func @_embed_concat_kernel(%arg0: i32, %arg1: memref<16x1xi32, #tpu.memory_space<vmem>>, %arg2: memref<16x1xi32, #tpu.memory_space<vmem>>, %arg3: memref<256x128xf32, #tpu.memory_space<vmem>>, %arg4: memref<16x128xf32, #tpu.memory_space<vmem>>) attributes {dimension_semantics = [#tpu.dimension_semantics<parallel>], iteration_bounds = array<i64: 1>, scalar_prefetch = 0 : i64, scratch_operands = 0 : i64, tpu.core_type = #tpu.core_type<tc>, window_params = [{transform_indices = @transform_0, window_bounds = array<i64: 16, 1>}, {transform_indices = @transform_1, window_bounds = array<i64: 16, 1>}, {pipeline_mode = #tpu.pipeline_mode<synchronous>, transform_indices = @transform_2, window_bounds = array<i64: 256, 128>}, {transform_indices = @transform_3, window_bounds = array<i64: 16, 128>}]} {
    %0 = tpu.iota {dimensions = array<i32: 1>} : vector<16x256xi32>
    %c0 = arith.constant 0 : index
    %c0_0 = arith.constant 0 : index
    %1 = vector.load %arg1[%c0, %c0_0] : memref<16x1xi32, #tpu.memory_space<vmem>>, vector<16x1xi32>
    %c0_1 = arith.constant 0 : index
    %c0_2 = arith.constant 0 : index
    %2 = vector.load %arg2[%c0_1, %c0_2] : memref<16x1xi32, #tpu.memory_space<vmem>>, vector<16x1xi32>
    %c64_i32 = arith.constant 64 : i32
    %3 = vector.broadcast %c64_i32 : i32 to vector<16x1xi32>
    %4 = arith.addi %2, %3 : vector<16x1xi32>
    %5 = vector.broadcast %1 : vector<16x1xi32> to vector<16x256xi32>
    %6 = arith.cmpi eq, %0, %5 : vector<16x256xi32>
    %7 = vector.broadcast %4 : vector<16x1xi32> to vector<16x256xi32>
    %8 = arith.cmpi eq, %0, %7 : vector<16x256xi32>
    %9 = arith.ori %6, %8 : vector<16x256xi1>
    %10 = arith.extui %9 : vector<16x256xi1> to vector<16x256xi32>
    %11 = arith.sitofp %10 : vector<16x256xi32> to vector<16x256xf32>
    %c0_3 = arith.constant 0 : index
    %c0_4 = arith.constant 0 : index
    %12 = vector.load %arg3[%c0_3, %c0_4] : memref<256x128xf32, #tpu.memory_space<vmem>>, vector<256x128xf32>
    %cst = arith.constant dense<0.000000e+00> : vector<16x128xf32>
    %13 = tpu.matmul %11, %12, %cst {dimension_numbers = #tpu.dot_dimension_numbers<[1], [0], [0], [1], [0, 0, 1, 1], [], []>, precision = #tpu.contract_precision<fp32>} : vector<16x256xf32>, vector<256x128xf32>, vector<16x128xf32> -> vector<16x128xf32>
    %c0_5 = arith.constant 0 : index
    %c0_6 = arith.constant 0 : index
    %14 = vector.load %arg4[%c0_5, %c0_6] : memref<16x128xf32, #tpu.memory_space<vmem>>, vector<16x128xf32>
    tpu.vector_store %arg4[%c0_5, %c0_6], %13 {strides = array<i32>} : memref<16x128xf32, #tpu.memory_space<vmem>>, vector<16x128xf32>,
    return
  }
  func.func @transform_0(%arg0: i32) -> (i32, i32) {
    %c0_i32 = arith.constant 0 : i32
    %c0_i32_0 = arith.constant 0 : i32
    return %arg0, %c0_i32 : i32, i32
  }
  func.func @transform_1(%arg0: i32) -> (i32, i32) {
    %c0_i32 = arith.constant 0 : i32
    %c0_i32_0 = arith.constant 0 : i32
    return %arg0, %c0_i32 : i32, i32
  }
  func.func @transform_2(%arg0: i32) -> (i32, i32) {
    %c0_i32 = arith.constant 0 : i32
    %c0_i32_0 = arith.constant 0 : i32
    %c0_i32_1 = arith.constant 0 : i32
    return %c0_i32, %c0_i32_0 : i32, i32
  }
  func.func @transform_3(%arg0: i32) -> (i32, i32) {
    %c0_i32 = arith.constant 0 : i32
    %c0_i32_0 = arith.constant 0 : i32
    return %arg0, %c0_i32 : i32, i32
  }
}

module attributes {stable_mosaic.version = 11 : i64} {
  func.func @_embed_concat_kernel(%arg0: i32, %arg1: memref<16x1xi32, #tpu.memory_space<vmem>>, %arg2: memref<16x1xi32, #tpu.memory_space<vmem>>, %arg3: memref<256x128xf32, #tpu.memory_space<vmem>>, %arg4: memref<16x128xf32, #tpu.memory_space<vmem>>) attributes {dimension_semantics = [#tpu.dimension_semantics<parallel>], iteration_bounds = array<i64: 1>, scalar_prefetch = 0 : i64, scratch_operands = 0 : i64, tpu.core_type = #tpu.core_type<tc>, window_params = [{transform_indices = @transform_0, window_bounds = array<i64: 16, 1>}, {transform_indices = @transform_1, window_bounds = array<i64: 16, 1>}, {pipeline_mode = #tpu.pipeline_mode<synchronous>, transform_indices = @transform_2, window_bounds = array<i64: 256, 128>}, {transform_indices = @transform_3, window_bounds = array<i64: 16, 128>}]} {
    %0 = tpu.iota {dimensions = array<i32: 1>} : vector<16x256xi32>
    %c0 = arith.constant 0 : index
    %c0_0 = arith.constant 0 : index
    %1 = vector.load %arg1[%c0, %c0_0] : memref<16x1xi32, #tpu.memory_space<vmem>>, vector<16x1xi32>
    %c0_1 = arith.constant 0 : index
    %c0_2 = arith.constant 0 : index
    %2 = vector.load %arg2[%c0_1, %c0_2] : memref<16x1xi32, #tpu.memory_space<vmem>>, vector<16x1xi32>
    %c64_i32 = arith.constant 64 : i32
    %3 = vector.broadcast %c64_i32 : i32 to vector<16x1xi32>
    %4 = arith.addi %2, %3 : vector<16x1xi32>
    %5 = vector.broadcast %1 : vector<16x1xi32> to vector<16x256xi32>
    %6 = arith.cmpi eq, %0, %5 : vector<16x256xi32>
    %7 = vector.broadcast %4 : vector<16x1xi32> to vector<16x256xi32>
    %8 = arith.cmpi eq, %0, %7 : vector<16x256xi32>
    %9 = arith.ori %6, %8 : vector<16x256xi1>
    %10 = arith.extui %9 : vector<16x256xi1> to vector<16x256xi32>
    %11 = arith.sitofp %10 : vector<16x256xi32> to vector<16x256xf32>
    %c0_3 = arith.constant 0 : index
    %c0_4 = arith.constant 0 : index
    %12 = vector.load %arg3[%c0_3, %c0_4] : memref<256x128xf32, #tpu.memory_space<vmem>>, vector<256x128xf32>
    %cst = arith.constant dense<0.000000e+00> : vector<16x128xf32>
    %13 = tpu.matmul %11, %12, %cst {dimension_numbers = #tpu.dot_dimension_numbers<[1], [0], [0], [1], [0, 0, 1, 1], [], []>, precision = #tpu.contract_precision<fp32>} : vector<16x256xf32>, vector<256x128xf32>, vector<16x128xf32> -> vector<16x128xf32>
    %c0_5 = arith.constant 0 : index
    %c0_6 = arith.constant 0 : index
    %14 = vector.load %arg4[%c0_5, %c0_6] : memref<16x128xf32, #tpu.memory_space<vmem>>, vector<16x128xf32>
    tpu.vector_store %arg4[%c0_5, %c0_6], %13 {strides = array<i32>} : memref<16x128xf32, #tpu.memory_space<vmem>>, vector<16x128xf32>,
    return
  }
  func.func @transform_0(%arg0: i32) -> (i32, i32) {
    %c0_i32 = arith.constant 0 : i32
    %c0_i32_0 = arith.constant 0 : i32
    return %arg0, %c0_i32 : i32, i32
  }
  func.func @transform_1(%arg0: i32) -> (i32, i32) {
    %c0_i32 = arith.constant 0 : i32
    %c0_i32_0 = arith.constant 0 : i32
    return %arg0, %c0_i32 : i32, i32
  }
  func.func @transform_2(%arg0: i32) -> (i32, i32) {
    %c0_i32 = arith.constant 0 : i32
    %c0_i32_0 = arith.constant 0 : i32
    %c0_i32_1 = arith.constant 0 : i32
    return %c0_i32, %c0_i32_0 : i32, i32
  }
  func.func @transform_3(%arg0: i32) -> (i32, i32) {
    %c0_i32 = arith.constant 0 : i32
    %c0_i32_0 = arith.constant 0 : i32
    return %arg0, %c0_i32 : i32, i32
  }
}

</mosaic_0001>

<bundles_post_ra>
// kernel: tpu_custom_call.1
= control target key start
LH: loop header
LB: loop body
LE: loop exit
PB: predicated region body
PF: predicated region fallthrough
CT: control target
= control target key end

     0   :  { %8 = vsyncpa [#allocation3], 0  ;;  %s1955_s0 = inlined_call_operand.vmem [shape: s32[16,1], index: 0, kind: input, shape index: {}]   ;;  %s1956_s1 = inlined_call_operand.vmem [shape: s32[16,1], index: 1, kind: input, shape index: {}]   ;;  %s1957_s2 = inlined_call_operand.hbm [shape: f32[256,128], index: 2, kind: input, shape index: {}]   ;;  %s1958_s3 = inlined_call_operand.hbm [shape: f32[16,128], index: 3, kind: output, shape index: {}]  }
   0x1   :  { %9 = vsyncpa [#allocation4], 0  ;;  %s1336_s12 = smov [#allocation2]  }
   0x2   :  { %s19_s13 = sshll.u32 %s1336_s12, 4  ;;  %s20_s13 = int_to_ptr.vmem [resolvable:$true] %s19_s13 }
   0x3   :  { %s1300_s14 = scalar_lea.vmem %s20_s13, 4096  ;;  %p1305_p1 = scmp.lt.s32.totalorder %s20_s13, %s20_s13 }
   0x4   :  { %p1301_p0 = scmp.ne.s32.totalorder %s20_s13, %s1300_s14  ;;  %p1306_p2 = scmp.lt.s32.totalorder %s1300_s14, %s1300_s14 }
   0x6   :  { %p1307_p3 = por %p1306_p2, %p1305_p1 }
   0x8   :  { %p1308_p4 = pnand %p1307_p3, %p1301_p0 }
   0xa   :  { %1311 = shalt.err (!%p1308_p4)
}
   0xb   :  { %s1337_s15 = smov 128   ;;  %s1338_s16 = smov 8  }
   0xc   :  { %25 = dma.hbm_to_vmem [thread:$0]  %s1957_s2, 4096, %s20_s13, [#allocation3], %s1337_s15, %s1337_s15, %s1338_s16  }
   0xd   :  { %1332 = dma.done.wait [#allocation3], 4096  }
   0xe   :  { %1333 = vsyncadd [#allocation3], 4294963200  ;;  %v1339_v0 = vmov 0   ;;  %v32_v1 = vld [vmem:[%s1955_s0] sm:$0xff]  ;;  %v33_v2 = vld [vmem:[%s1955_s0 + $0x8] sm:$0xff]  ;;  %s1342_s0 = smov [#allocation5]  }
   0xf   :  { %1290 = vset.pattern.permute.xlu0 %v1339_v0  ;;  %1291 = vset.pattern.permute.xlu1 %v1339_v0  ;;  %v34_v3 = vld [vmem:[%s1956_s1] sm:$0xff]  ;;  %v35_v5 = vld [vmem:[%s1956_s1 + $0x8] sm:$0xff]  ;;  %v101_v6 = vld [vmem:[#allocation2 + $0xf8] sm:$0xff]  ;;  %s1027_s1 = sshll.u32 %s1342_s0, 4  ;;  %s1028_s1 = int_to_ptr.vmem [resolvable:$true] %s1027_s1 }
  0x10   :  { %39 = vperm.xlu0 %1290, %v32_v1   ;;  %42 = vperm.xlu1 %1291, %v33_v2   ;;  %v36_v4 = vadd.s32 64, %v34_v3  ;;  %v85_v7 = vld [vmem:[#allocation2 + $0x78] sm:$0xff]  ;;  %v37_v8 = vadd.s32 64, %v35_v5  ;;  %v1381_v9 = vand.u32 4294901760, %v101_v6  ;;  %v100_v11 = vld [vmem:[#allocation2 + $0xf0] sm:$0xff]  ;;  %v99_v13 = vld [vmem:[#allocation2 + $0xe8] sm:$0xff]  ;;  %p1317_p6 = scmp.lt.s32.totalorder %s1028_s1, %s1028_s1 }
  0x11   :  { %v1383_v10 = vand.u32 4294901760, %v85_v7  ;;  %v84_v12 = vld [vmem:[#allocation2 + $0x70] sm:$0xff]  ;;  %v1385_v14 = vand.u32 4294901760, %v100_v11  ;;  %v1389_v16 = vand.u32 4294901760, %v99_v13  ;;  %v83_v17 = vld [vmem:[#allocation2 + $0x68] sm:$0xff]  ;;  %v98_v18 = vld [vmem:[#allocation2 + $0xe0] sm:$0xff] }
  0x12   :  { %v1387_v15 = vand.u32 4294901760, %v84_v12  ;;  %v82_v19 = vld [vmem:[#allocation2 + $0x60] sm:$0xff]  ;;  %v1392_v20 = vsub.f32 %v101_v6, %v1381_v9  ;;  %v1397_v22 = vand.u32 4294901760, %v83_v17  ;;  %v1399_v23 = vand.u32 4294901760, %v98_v18  ;;  %1055 = vmatprep.subr.mxu0 %v1381_v9  ;;  %v97_v44 = vld [vmem:[#allocation2 + $0xd8] sm:$0xff]  ;;  %v96_v50 = vld [vmem:[#allocation2 + $0xd0] sm:$0xff] }
  0x13   :  { %v1395_v21 = vsub.f32 %v85_v7, %v1383_v10  ;;  %v1403_v24 = vsub.f32 %v100_v11, %v1385_v14  ;;  %v1409_v26 = vsub.f32 %v99_v13, %v1389_v16  ;;  %v1411_v27 = vand.u32 4294901760, %v82_v19  ;;  %1056 = vmatpush3.msra.mxu0 %v1383_v10  ;;  %v81_v45 = vld [vmem:[#allocation2 + $0x58] sm:$0xff]  ;;  %v80_v51 = vld [vmem:[#allocation2 + $0x50] sm:$0xff]  ;;  %v95_v52 = vld [vmem:[#allocation2 + $0xc8] sm:$0xff]  ;;  %s1312_s26 = scalar_lea.vmem %s1028_s1, 256 }
  0x14   :  { %2030 = vst [vmem:[#allocation8_spill] sm:$0xff] %v1392_v20  ;;  %49 = vperm.xlu0 %1290, %v36_v4   ;;  %52 = vperm.xlu1 %1291, %v37_v8   ;;  %v1406_v25 = vsub.f32 %v84_v12, %v1387_v15  ;;  %v1978_v28 = vand.u32 4294901760, %v1392_v20  ;;  %v1416_v30 = vsub.f32 %v83_v17, %v1397_v22  ;;  %v79_v57 = vld [vmem:[#allocation2 + $0x48] sm:$0xff]  ;;  %v94_v58 = vld [vmem:[#allocation2 + $0xc0] sm:$0xff]  ;;  %v1460_v61 = vand.u32 4294901760, %v97_v44  ;;  %p1313_p5 = scmp.ne.s32.totalorder %s1028_s1, %s1312_s26  ;;  %p1318_p7 = scmp.lt.s32.totalorder %s1312_s26, %s1312_s26 }
  0x15   :  { %v1975_v29 = vand.u32 4294901760, %v1395_v21  ;;  %v1419_v31 = vsub.f32 %v98_v18, %v1399_v23  ;;  %v1974_v32 = vand.u32 4294901760, %v1403_v24  ;;  %v1970_v34 = vand.u32 4294901760, %v1409_v26  ;;  %1057 = vmatprep.subr.mxu0 %v1385_v14  ;;  %v78_v63 = vld [vmem:[#allocation2 + $0x40] sm:$0xff] }
  0x16   :  { %v1973_v33 = vand.u32 4294901760, %v1406_v25  ;;  %v1426_v35 = vsub.f32 %v82_v19, %v1411_v27  ;;  %v345_v36 = vsub.f32 %v1392_v20, %v1978_v28  ;;  %v1969_v38 = vand.u32 4294901760, %v1416_v30  ;;  %1058 = vmatpush3.msra.mxu0 %v1387_v15  ;;  %v88_v28 = vld [vmem:[#allocation2 + $0x90] sm:$0xff]  ;;  %p1319_p8 = por %p1318_p7, %p1317_p6 }
  0x17   :  { %v233_v37 = vsub.f32 %v1395_v21, %v1975_v29  ;;  %v1968_v39 = vand.u32 4294901760, %v1419_v31  ;;  %v352_v40 = vsub.f32 %v1403_v24, %v1974_v32  ;;  %v359_v42 = vsub.f32 %v1409_v26, %v1970_v34  ;;  %1059 = vmatprep.subr.mxu0 %v1389_v16  ;;  %v73_v32 = vld [vmem:[#allocation2 + $0x18] sm:$0xff] }
  0x18   :  { %v240_v41 = vsub.f32 %v1406_v25, %v1973_v33  ;;  %v1966_v43 = vand.u32 4294901760, %v1426_v35  ;;  %v346_v46 = vand.u32 4294901760, %v345_v36  ;;  %v247_v48 = vsub.f32 %v1416_v30, %v1969_v38  ;;  %1060 = vmatpush3.msra.mxu0 %v1397_v22  ;;  %v89_v33 = vld [vmem:[#allocation2 + $0x98] sm:$0xff]  ;;  %p1320_p9 = pnand %p1319_p8, %p1313_p5 }
  0x19   :  { %v234_v47 = vand.u32 4294901760, %v233_v37  ;;  %v366_v49 = vsub.f32 %v1419_v31, %v1968_v39  ;;  %v353_v53 = vand.u32 4294901760, %v352_v40  ;;  %v360_v55 = vand.u32 4294901760, %v359_v42  ;;  %1061 = vmatprep.subr.mxu0 %v1399_v23 }
  0x1a   :  { %v241_v54 = vand.u32 4294901760, %v240_v41  ;;  %v254_v56 = vsub.f32 %v1426_v35, %v1966_v43  ;;  %1093 = vmatprep.subr.mxu1 %v346_v46  ;;  %v248_v59 = vand.u32 4294901760, %v247_v48  ;;  %v1462_v62 = vand.u32 4294901760, %v81_v45  ;;  %1062 = vmatpush3.msra.mxu0 %v1411_v27 }
  0x1b   :  { %v367_v60 = vand.u32 4294901760, %v366_v49  ;;  %1094 = vmatpush3.msra.mxu1 %v234_v47  ;;  %v1465_v1 = vand.u32 4294901760, %v96_v50  ;;  %v1467_v2 = vand.u32 4294901760, %v80_v51  ;;  %v1469_v3 = vand.u32 4294901760, %v95_v52  ;;  %1063 = vmatprep.subr.mxu0 %v1460_v61 }
  0x1c   :  { %v255_v0 = vand.u32 4294901760, %v254_v56  ;;  %1095 = vmatprep.subr.mxu1 %v353_v53  ;;  %v1472_v4 = vsub.f32 %v97_v44, %v1460_v61  ;;  %v1475_v5 = vsub.f32 %v81_v45, %v1462_v62  ;;  %v1477_v6 = vand.u32 4294901760, %v79_v57  ;;  %1064 = vmatpush3.msra.mxu0 %v1462_v62  ;;  %v77_v53 = vld [vmem:[#allocation2 + $0x38] sm:$0xff] }
  0x1d   :  { %v1479_v7 = vand.u32 4294901760, %v94_v58  ;;  %1096 = vmatpush3.msra.mxu1 %v241_v54  ;;  %v1483_v8 = vsub.f32 %v96_v50, %v1465_v1  ;;  %v1486_v11 = vsub.f32 %v80_v51, %v1467_v2  ;;  %v1489_v12 = vsub.f32 %v95_v52, %v1469_v3  ;;  %1065 = vmatprep.subr.mxu0 %v1465_v1  ;;  %v93_v52 = vld [vmem:[#allocation2 + $0xb8] sm:$0xff] }
  0x1e   :  { %v1491_v13 = vand.u32 4294901760, %v78_v63  ;;  %1097 = vmatprep.subr.mxu1 %v360_v55  ;;  %v1965_v17 = vand.u32 4294901760, %v1472_v4  ;;  %v1964_v18 = vand.u32 4294901760, %v1475_v5  ;;  %v1497_v19 = vsub.f32 %v79_v57, %v1477_v6  ;;  %1066 = vmatpush3.msra.mxu0 %v1467_v2 }
  0x1f   :  { %v1500_v36 = vsub.f32 %v94_v58, %v1479_v7  ;;  %1098 = vmatpush3.msra.mxu1 %v248_v59  ;;  %v1962_v37 = vand.u32 4294901760, %v1483_v8  ;;  %v1960_v40 = vand.u32 4294901760, %v1486_v11  ;;  %v1959_v41 = vand.u32 4294901760, %v1489_v12  ;;  %1067 = vmatprep.subr.mxu0 %v1469_v3  ;;  %v92_v58 = vld [vmem:[#allocation2 + $0xb0] sm:$0xff] }
  0x20   :  { %v1507_v42 = vsub.f32 %v78_v63, %v1491_v13  ;;  %1099 = vmatprep.subr.mxu1 %v367_v60  ;;  %v373_v44 = vsub.f32 %v1472_v4, %v1965_v17  ;;  %v261_v45 = vsub.f32 %v1475_v5, %v1964_v18  ;;  %v1961_v46 = vand.u32 4294901760, %v1497_v19  ;;  %1068 = vmatpush3.msra.mxu0 %v1477_v6  ;;  %v76_v59 = vld [vmem:[#allocation2 + $0x30] sm:$0xff]  ;;  %v91_v60 = vld [vmem:[#allocation2 + $0xa8] sm:$0xff]  ;;  %v74_v17 = vld [vmem:[#allocation2 + $0x20] sm:$0xff] }
  0x21   :  { %2031 = vst [vmem:[#allocation9_spill] sm:$0xff] %v1500_v36  ;;  %v1963_v47 = vand.u32 4294901760, %v1500_v36  ;;  %1100 = vmatpush3.msra.mxu1 %v255_v0  ;;  %v380_v48 = vsub.f32 %v1483_v8, %v1962_v37  ;;  %v268_v49 = vsub.f32 %v1486_v11, %v1960_v40  ;;  %v387_v50 = vsub.f32 %v1489_v12, %v1959_v41  ;;  %v90_v40 = vld [vmem:[#allocation2 + $0xa0] sm:$0xff] }
  0x22   :  { %2032 = vst [vmem:[#allocation10_spill] sm:$0xff] %v1507_v42  ;;  %v1967_v51 = vand.u32 4294901760, %v1507_v42  ;;  %v374_v54 = vand.u32 4294901760, %v373_v44  ;;  %v262_v55 = vand.u32 4294901760, %v261_v45  ;;  %v275_v56 = vsub.f32 %v1497_v19, %v1961_v46  ;;  %1069 = vmatprep.subr.mxu0 %v1479_v7  ;;  %v75_v45 = vld [vmem:[#allocation2 + $0x28] sm:$0xff] }
  0x23   :  { %v394_v57 = vsub.f32 %v1500_v36, %v1963_v47  ;;  %v381_v63 = vand.u32 4294901760, %v380_v48  ;;  %v269_v0 = vand.u32 4294901760, %v268_v49  ;;  %v388_v41 = vand.u32 4294901760, %v387_v50  ;;  %1070 = vmatpush3.msra.mxu0 %v1491_v13 }
  0x24   :  { %v282_v44 = vsub.f32 %v1507_v42, %v1967_v51  ;;  %1101 = vmatprep.subr.mxu1 %v374_v54  ;;  %v276_v46 = vand.u32 4294901760, %v275_v56  ;;  %v1541_v47 = vand.u32 4294901760, %v93_v52  ;;  %v1543_v18 = vand.u32 4294901760, %v77_v53  ;;  %v70_v42 = vld [vmem:[#allocation2] sm:$0xff] }
  0x25   :  { %v395_v37 = vand.u32 4294901760, %v394_v57  ;;  %1102 = vmatpush3.msra.mxu1 %v262_v55  ;;  %v1545_v49 = vand.u32 4294901760, %v92_v58  ;;  %v1547_v50 = vand.u32 4294901760, %v76_v59  ;;  %v1549_v43 = vand.u32 4294901760, %v91_v60 }
  0x26   :  { %v283_v48 = vand.u32 4294901760, %v282_v44  ;;  %1103 = vmatprep.subr.mxu1 %v381_v63  ;;  %v1552_v51 = vsub.f32 %v93_v52, %v1541_v47  ;;  %v1555_v54 = vsub.f32 %v77_v53, %v1543_v18  ;;  %v1557_v56 = vand.u32 4294901760, %v75_v45  ;;  %1071 = vmatprep.subr.mxu0 %v1541_v47 }
  0x27   :  { %v1559_v57 = vand.u32 4294901760, %v90_v40  ;;  %1104 = vmatpush3.msra.mxu1 %v269_v0  ;;  %v1563_v55 = vsub.f32 %v92_v58, %v1545_v49  ;;  %v1566_v44 = vsub.f32 %v76_v59, %v1547_v50  ;;  %v1569_v63 = vsub.f32 %v91_v60, %v1549_v43  ;;  %1072 = vmatpush3.msra.mxu0 %v1543_v18 }
  0x28   :  { %2033 = vst [vmem:[#allocation11_spill] sm:$0xff] %v1552_v51  ;;  %2034 = vst [vmem:[#allocation12_spill] sm:$0xff] %v1555_v54  ;;  %v1571_v52 = vand.u32 4294901760, %v74_v17  ;;  %1105 = vmatprep.subr.mxu1 %v388_v41  ;;  %v1971_v53 = vand.u32 4294901760, %v1552_v51  ;;  %v1972_v39 = vand.u32 4294901760, %v1555_v54  ;;  %v1577_v0 = vsub.f32 %v75_v45, %v1557_v56  ;;  %1073 = vmatprep.subr.mxu0 %v1545_v49 }
  0x29   :  { %2035 = vst [vmem:[#allocation13_spill] sm:$0xff] %v1563_v55  ;;  %2036 = vst [vmem:[#allocation14_spill] sm:$0xff] %v1566_v44  ;;  %v1580_v58 = vsub.f32 %v90_v40, %v1559_v57  ;;  %1106 = vmatpush3.msra.mxu1 %v276_v46  ;;  %v1976_v59 = vand.u32 4294901760, %v1563_v55  ;;  %v1977_v60 = vand.u32 4294901760, %v1566_v44  ;;  %v1983_v38 = vand.u32 4294901760, %v1569_v63  ;;  %1074 = vmatpush3.msra.mxu0 %v1547_v50 }
  0x2a   :  { %2037 = vst [vmem:[#allocation15_spill] sm:$0xff] %v1569_v63  ;;  %2038 = vst [vmem:[#allocation16_spill] sm:$0xff] %v1577_v0  ;;  %v1587_v41 = vsub.f32 %v74_v17, %v1571_v52  ;;  %1107 = vmatprep.subr.mxu1 %v395_v37  ;;  %v401_v40 = vsub.f32 %v1552_v51, %v1971_v53  ;;  %v289_v46 = vsub.f32 %v1555_v54, %v1972_v39  ;;  %v86_v51 = vld [vmem:[#allocation2 + $0x80] sm:$0xff] }
  0x2b   :  { %2039 = vst [vmem:[#allocation17_spill] sm:$0xff] %v1580_v58  ;;  %v1990_v45 = vand.u32 4294901760, %v1577_v0  ;;  %v1993_v34 = vand.u32 4294901760, %v1580_v58  ;;  %1075 = vmatprep.subr.mxu0 %v1549_v43  ;;  %1108 = vmatpush3.msra.mxu1 %v283_v48  ;;  %v408_v17 = vsub.f32 %v1563_v55, %v1976_v59  ;;  %v296_v37 = vsub.f32 %v1566_v44, %v1977_v60  ;;  %v72_v44 = vld [vmem:[#allocation2 + $0x10] sm:$0xff]  ;;  %v87_v55 = vld [vmem:[#allocation2 + $0x88] sm:$0xff] }
  0x2c   :  { %2040 = vst [vmem:[#allocation18_spill] sm:$0xff] %v1587_v41  ;;  %v415_v53 = vsub.f32 %v1569_v63, %v1983_v38  ;;  %1076 = vmatpush3.msra.mxu0 %v1557_v56  ;;  %v402_v29 = vand.u32 4294901760, %v401_v40  ;;  %v290_v48 = vand.u32 4294901760, %v289_v46  ;;  %v2041_v54 = vand.u32 4294901760, %v1587_v41  ;;  %v71_v46 = vld [vmem:[#allocation2 + $0x8] sm:$0xff] }
  0x2d   :  { %v303_v59 = vsub.f32 %v1577_v0, %v1990_v45  ;;  %v422_v60 = vsub.f32 %v1580_v58, %v1993_v34  ;;  %1077 = vmatprep.subr.mxu0 %v1559_v57  ;;  %v409_v38 = vand.u32 4294901760, %v408_v17  ;;  %v297_v39 = vand.u32 4294901760, %v296_v37 }
  0x2e   :  { %v416_v63 = vand.u32 4294901760, %v415_v53  ;;  %v310_v40 = vsub.f32 %v1587_v41, %v2041_v54  ;;  %1078 = vmatpush3.msra.mxu0 %v1571_v52  ;;  %1109 = vmatprep.subr.mxu1 %v402_v29  ;;  %v1621_v34 = vand.u32 4294901760, %v89_v33  ;;  %v1623_v58 = vand.u32 4294901760, %v73_v32 }
  0x2f   :  { %v304_v45 = vand.u32 4294901760, %v303_v59  ;;  %v423_v0 = vand.u32 4294901760, %v422_v60  ;;  %1110 = vmatpush3.msra.mxu1 %v290_v48  ;;  %v1625_v37 = vand.u32 4294901760, %v88_v28  ;;  %v1627_v53 = vand.u32 4294901760, %v72_v44 }
  0x30   :  { %2042 = vst [vmem:[#allocation19_spill] sm:$0xff] %v1623_v58  ;;  %v311_v17 = vand.u32 4294901760, %v310_v40  ;;  %v1629_v36 = vand.u32 4294901760, %v87_v55  ;;  %1111 = vmatprep.subr.mxu1 %v409_v38  ;;  %v1632_v54 = vsub.f32 %v89_v33, %v1621_v34  ;;  %v1635_v29 = vsub.f32 %v73_v32, %v1623_v58  ;;  %1079 = vmatprep.subr.mxu0 %v1621_v34 }
  0x31   :  { %v1637_v59 = vand.u32 4294901760, %v71_v46  ;;  %v1639_v60 = vand.u32 4294901760, %v86_v51  ;;  %1112 = vmatpush3.msra.mxu1 %v297_v39  ;;  %v1643_v48 = vsub.f32 %v88_v28, %v1625_v37  ;;  %v1646_v40 = vsub.f32 %v72_v44, %v1627_v53  ;;  %1080 = vmatpush3.msra.mxu0 %v1623_v58 }
  0x32   :  { %2043 = vst [vmem:[#allocation20_spill] sm:$0xff] %v1632_v54  ;;  %2044 = vst [vmem:[#allocation21_spill] sm:$0xff] %v1635_v29  ;;  %v1649_v38 = vsub.f32 %v87_v55, %v1629_v36  ;;  %v1651_v33 = vand.u32 4294901760, %v70_v42  ;;  %1113 = vmatprep.subr.mxu1 %v416_v63  ;;  %v2004_v32 = vand.u32 4294901760, %v1632_v54  ;;  %v2007_v41 = vand.u32 4294901760, %v1635_v29  ;;  %1081 = vmatprep.subr.mxu0 %v1625_v37 }
  0x33   :  { %2045 = vst [vmem:[#allocation22_spill] sm:$0xff] %v1643_v48  ;;  %2046 = vst [vmem:[#allocation23_spill] sm:$0xff] %v1646_v40  ;;  %v1657_v39 = vsub.f32 %v71_v46, %v1637_v59  ;;  %v1660_v28 = vsub.f32 %v86_v51, %v1639_v60  ;;  %1114 = vmatpush3.msra.mxu1 %v304_v45  ;;  %v2010_v55 = vand.u32 4294901760, %v1643_v48  ;;  %1082 = vmatpush3.msra.mxu0 %v1627_v53 }
  0x34   :  { %v1667_v63 = vsub.f32 %v70_v42, %v1651_v33  ;;  %1115 = vmatprep.subr.mxu1 %v423_v0  ;;  %v429_v51 = vsub.f32 %v1632_v54, %v2004_v32  ;;  %v317_v45 = vsub.f32 %v1635_v29, %v2007_v41  ;;  %1083 = vmatprep.subr.mxu0 %v1629_v36  ;;  %v2048_v0 = vand.u32 4294901760, %v1646_v40 }
  0x35   :  { %1116 = vmatpush3.msra.mxu1 %v311_v17  ;;  %v436_v42 = vsub.f32 %v1643_v48, %v2010_v55  ;;  %v2049_v32 = vand.u32 4294901760, %v1649_v38  ;;  %1084 = vmatpush3.msra.mxu0 %v1637_v59  ;;  %v2050_v17 = vand.u32 4294901760, %v1657_v39  ;;  %v2051_v55 = vand.u32 4294901760, %v1660_v28 }
  0x36   :  { %2047 = vst [vmem:[#allocation24_spill] sm:$0xff] %v1667_v63  ;;  %v324_v58 = vsub.f32 %v1646_v40, %v2048_v0  ;;  %v2015_v41 = vand.u32 4294901760, %v1667_v63  ;;  %v430_v44 = vand.u32 4294901760, %v429_v51  ;;  %v318_v46 = vand.u32 4294901760, %v317_v45  ;;  %1085 = vmatprep.subr.mxu0 %v1639_v60 }
  0x37   :  { %v443_v54 = vsub.f32 %v1649_v38, %v2049_v32  ;;  %v331_v29 = vsub.f32 %v1657_v39, %v2050_v17  ;;  %v450_v48 = vsub.f32 %v1660_v28, %v2051_v55  ;;  %v437_v0 = vand.u32 4294901760, %v436_v42  ;;  %1086 = vmatpush3.msra.mxu0 %v1651_v33 }
  0x38   :  { %v325_v40 = vand.u32 4294901760, %v324_v58  ;;  %v338_v32 = vsub.f32 %v1667_v63, %v2015_v41  ;;  %1117 = vmatprep.subr.mxu1 %v430_v44  ;;  %1131 = vmatprep.subr.mxu0 %v1392_v20  ;;  %v29_v58 = vlaneseq }
  0x39   :  { %v444_v51 = vand.u32 4294901760, %v443_v54  ;;  %1118 = vmatpush3.msra.mxu1 %v318_v46  ;;  %v332_v45 = vand.u32 4294901760, %v331_v29  ;;  %v451_v17 = vand.u32 4294901760, %v450_v48  ;;  %v2052_v29 = vmov 0 }
  0x3a   :  { %1119 = vmatprep.subr.mxu1 %v437_v0  ;;  %v339_v55 = vand.u32 4294901760, %v338_v32  ;;  %v30_v42 = vand.u32 127, %v29_v58 }
  0x3b   :  { %1120 = vmatpush3.msra.mxu1 %v325_v40  ;;  %v1340_v40 = vmov 0.0  }
  0x3c   :  { %1121 = vmatprep.subr.mxu1 %v444_v51  ;;  %v31_v44 = vadd.s32 128, %v30_v42 }
  0x3d   :  { %1122 = vmatpush3.msra.mxu1 %v332_v45  ;;  %v2060_v45 = vmov 0 }
  0x3e   :  { %1123 = vmatprep.subr.mxu1 %v451_v17 }
  0x3f   :  { %1124 = vmatpush3.msra.mxu1 %v339_v55 }
  0x40   :  { %1169 = vmatprep.subr.mxu1 %v1381_v9 }
  0x8b   :  { %v40_v41 = vpop.permute.xlu0 %39  ;;  %v43_v63 = vpop.permute.xlu1 %42 }
  0x8c   :  { %vm44_vm0 = vcmp.eq.s32.totalorder %v30_v42, %v40_v41  ;;  %vm46_vm1 = vcmp.eq.s32.totalorder %v30_v42, %v43_v63  ;;  %vm45_vm5 = vcmp.eq.s32.totalorder %v31_v44, %v40_v41  ;;  %vm47_vm6 = vcmp.eq.s32.totalorder %v31_v44, %v43_v63 }
  0x8d   :  { %v2022_v41 = vmov 1.0  }
  0x8f   :  { %v50_v54 = vpop.permute.xlu0 %49  ;;  %v53_v20 = vpop.permute.xlu1 %52 }
  0x90   :  { %vm54_vm2 = vcmp.eq.s32.totalorder %v30_v42, %v50_v54  ;;  %vm55_vm3 = vcmp.eq.s32.totalorder %v31_v44, %v50_v54  ;;  %vm56_vm4 = vcmp.eq.s32.totalorder %v30_v42, %v53_v20  ;;  %vm57_vm8 = vcmp.eq.s32.totalorder %v31_v44, %v53_v20 }
  0x91   :  { %vm1703_vm7 = vmor %vm44_vm0, %vm54_vm2  ;;  %v2057_v20 = vmov 0 }
  0x92   :  { %v2053_v29 = vsel %vm1703_vm7, 4294967295, %v2052_v29  ;;  %vm1707_vm9 = vmor %vm45_vm5, %vm55_vm3  ;;  %v1039_v46 = vsel %vm1703_vm7, 1.0, %v1340_v40 }
  0x93   :  { %2054 = vst [vmem:[#allocation25_spill] sm:$0xff] %v2053_v29  ;;  %v1040_v0 = vsel %vm1707_vm9, 1.0, %v1340_v40  ;;  %v1715_v32 = vsub.f32 %v1039_v46, %v1039_v46  ;;  %1043 = vmatprep.mubr.msk.f32.mxu1 %vm1707_vm9, %v2022_v41  ;;  %vm1721_vm10 = vmor %vm46_vm1, %vm56_vm4  ;;  %v2075_v29 = vld [vmem:[#allocation20_spill] sm:$0xff] }
  0x94   :  { %v2058_v20 = vsel %vm1721_vm10, 4294967295, %v2057_v20  ;;  %v199_v51 = vsub.f32 %v1040_v0, %v1040_v0  ;;  %vm1725_vm11 = vmor %vm47_vm6, %vm57_vm8  ;;  %v1041_v17 = vsel %vm1721_vm10, 1.0, %v1340_v40  ;;  %1044 = vmatmul.mubr.msk.f32.vlgmr.msra.gmra.mxu1 %vm1703_vm7, %v2022_v41 }
  0x95   :  { %2059 = vst [vmem:[#allocation26_spill] sm:$0xff] %v2058_v20  ;;  %v2061_v45 = vsel %vm1725_vm11, 4294967295, %v2060_v45  ;;  %v1042_v55 = vsel %vm1725_vm11, 1.0, %v1340_v40  ;;  %v1736_v63 = vsub.f32 %v1041_v17, %v1041_v17  ;;  %1170 = vmatpush3.msra.mxu1 %v1383_v10  ;;  %1045 = vmatprep.mubr.msk.f32.mxu1 %vm1725_vm11, %v2022_v41  ;;  %v2019_v58 = vand.u32 4294901760, %v1715_v32 }
  0x96   :  { %2062 = vst [vmem:[#allocation27_spill] sm:$0xff] %v2061_v45  ;;  %v1743_v42 = vsub.f32 %v1042_v55, %v1042_v55  ;;  %1171 = vmatprep.subr.mxu1 %v1385_v14  ;;  %v200_v44 = vand.u32 4294901760, %v199_v51  ;;  %v2074_v20 = vand.u32 4294901760, %v1715_v32 }
  0x97   :  { %1172 = vmatpush3.msra.mxu1 %v1387_v15  ;;  %v207_v54 = vsub.f32 %v1715_v32, %v2019_v58  ;;  %v2024_v40 = vand.u32 4294901760, %v1736_v63 }
  0x98   :  { %1173 = vmatprep.subr.mxu1 %v1389_v16  ;;  %1046 = vmatmul.mubr.msk.f32.gmra.mxu1 %vm1721_vm10, %v2022_v41  ;;  %v201_v46 = vsub.f32 %v199_v51, %v200_v44  ;;  %v2025_v0 = vand.u32 4294901760, %v1743_v42  ;;  %v2071_v41 = vld [vmem:[#allocation16_spill] sm:$0xff] }
  0x99   :  { %1174 = vmatpush3.msra.mxu1 %v1397_v22  ;;  %714 = vmatprep.mubr.f32.mxu1 %v200_v44  ;;  %v208_v17 = vand.u32 4294901760, %v207_v54  ;;  %v222_v45 = vsub.f32 %v1736_v63, %v2024_v40  ;;  %v2072_v40 = vld [vmem:[#allocation17_spill] sm:$0xff] }
  0x9a   :  { %1175 = vmatprep.subr.mxu1 %v1399_v23  ;;  %v202_v55 = vand.u32 4294901760, %v201_v46  ;;  %v216_v58 = vsub.f32 %v1743_v42, %v2025_v0  ;;  %v2066_v46 = vld [vmem:[#allocation19_spill] sm:$0xff]  ;;  %v2073_v0 = vld [vmem:[#allocation18_spill] sm:$0xff] }
  0x9b   :  { %1176 = vmatpush3.msra.mxu1 %v1411_v27  ;;  %v223_v54 = vand.u32 4294901760, %v222_v45  ;;  %v2064_v45 = vld [vmem:[#allocation10_spill] sm:$0xff] }
  0x9c   :  { %1177 = vmatprep.subr.mxu1 %v1460_v61  ;;  %203 = vmatprep.mubr.f32.mxu0 %v202_v55  ;;  %v217_v44 = vand.u32 4294901760, %v216_v58  ;;  %v2065_v58 = vld [vmem:[#allocation11_spill] sm:$0xff]  ;;  %v2068_v55 = vld [vmem:[#allocation13_spill] sm:$0xff] }
  0x9d   :  { %1178 = vmatpush3.msra.mxu1 %v1462_v62  ;;  %209 = vmatmul.mubr.f32.vlgmr.msra.gmra.mxu0 %v208_v17  ;;  %v2067_v17 = vld [vmem:[#allocation12_spill] sm:$0xff] }
  0x9e   :  { %1132 = vmatpush3.msra.mxu0 %v1395_v21  ;;  %1179 = vmatprep.subr.mxu1 %v1465_v1 }
  0x9f   :  { %1133 = vmatprep.subr.mxu0 %v1403_v24  ;;  %1180 = vmatpush3.msra.mxu1 %v1467_v2 }
  0xa0   :  { %1134 = vmatpush3.msra.mxu0 %v1406_v25  ;;  %1181 = vmatprep.subr.mxu1 %v1469_v3 }
  0xa1   :  { %218 = vmatprep.mubr.f32.mxu0 %v217_v44  ;;  %1135 = vmatprep.subr.mxu0 %v1409_v26  ;;  %v2069_v44 = vld [vmem:[#allocation14_spill] sm:$0xff] }
  0xa2   :  { %1182 = vmatpush3.msra.mxu1 %v1477_v6  ;;  %224 = vmatmul.mubr.f32.gmra.mxu0 %v223_v54  ;;  %v2070_v54 = vld [vmem:[#allocation15_spill] sm:$0xff] }
  0xa3   :  { %1136 = vmatpush3.msra.mxu0 %v1416_v30  ;;  %1183 = vmatprep.subr.mxu1 %v1479_v7 }
  0xa4   :  { %1137 = vmatprep.subr.mxu0 %v1419_v31  ;;  %598 = vmatprep.mubr.f32.mxu0 %v199_v51  ;;  %v2063_v51 = vld [vmem:[#allocation9_spill] sm:$0xff] }
  0xa5   :  { %1184 = vmatpush3.msra.mxu1 %v1491_v13  ;;  %1138 = vmatpush3.msra.mxu0 %v1426_v35 }
  0xa6   :  { %1185 = vmatprep.subr.mxu1 %v1541_v47  ;;  %1139 = vmatprep.subr.mxu0 %v1472_v4 }
  0xa7   :  { %1186 = vmatpush3.msra.mxu1 %v1543_v18  ;;  %1140 = vmatpush3.msra.mxu0 %v1475_v5 }
  0xa8   :  { %1187 = vmatprep.subr.mxu1 %v1545_v49  ;;  %1141 = vmatprep.subr.mxu0 %v1483_v8 }
  0xa9   :  { %1188 = vmatpush3.msra.mxu1 %v1547_v50  ;;  %1142 = vmatpush3.msra.mxu0 %v1486_v11 }
  0xaa   :  { %1189 = vmatprep.subr.mxu1 %v1549_v43  ;;  %1143 = vmatprep.subr.mxu0 %v1489_v12 }
  0xab   :  { %1190 = vmatpush3.msra.mxu1 %v1557_v56  ;;  %1144 = vmatpush3.msra.mxu0 %v1497_v19 }
  0xac   :  { %1191 = vmatprep.subr.mxu1 %v1559_v57  ;;  %1145 = vmatprep.subr.mxu0 %v2063_v51 }
  0xad   :  { %1192 = vmatpush3.msra.mxu1 %v1571_v52  ;;  %1146 = vmatpush3.msra.mxu0 %v2064_v45 }
  0xae   :  { %1193 = vmatprep.subr.mxu1 %v1621_v34  ;;  %1147 = vmatprep.subr.mxu0 %v2065_v58 }
  0xaf   :  { %1194 = vmatpush3.msra.mxu1 %v2066_v46  ;;  %1148 = vmatpush3.msra.mxu0 %v2067_v17 }
  0xb0   :  { %1195 = vmatprep.subr.mxu1 %v1625_v37  ;;  %1149 = vmatprep.subr.mxu0 %v2068_v55 }
  0xb1   :  { %1196 = vmatpush3.msra.mxu1 %v1627_v53  ;;  %1150 = vmatpush3.msra.mxu0 %v2069_v44 }
  0xb2   :  { %1197 = vmatprep.subr.mxu1 %v1629_v36  ;;  %1151 = vmatprep.subr.mxu0 %v2070_v54  ;;  %v2076_v54 = vand.u32 4294901760, %v1743_v42 }
  0xb3   :  { %1198 = vmatpush3.msra.mxu1 %v1637_v59  ;;  %1152 = vmatpush3.msra.mxu0 %v2071_v41  ;;  %v2077_v41 = vld [vmem:[#allocation21_spill] sm:$0xff] }
  0xb4   :  { %1199 = vmatprep.subr.mxu1 %v1639_v60  ;;  %1153 = vmatprep.subr.mxu0 %v2072_v40  ;;  %v2078_v40 = vld [vmem:[#allocation22_spill] sm:$0xff] }
  0xb5   :  { %1200 = vmatpush3.msra.mxu1 %v1651_v33  ;;  %1154 = vmatpush3.msra.mxu0 %v2073_v0  ;;  %v2079_v0 = vld [vmem:[#allocation23_spill] sm:$0xff] }
  0xb6   :  { %718 = vmatmul.mubr.f32.vlgmr.msra.gmra.mxu1 %v2074_v20  ;;  %1245 = vmatprep.subr.mxu1 %v1381_v9  ;;  %v2080_v20 = vand.u32 4294901760, %v1736_v63  ;;  %v2081_v9 = vmov 1.0  }
  0xb7   :  { %1155 = vmatprep.subr.mxu0 %v2075_v29  ;;  %725 = vmatprep.mubr.f32.mxu1 %v2076_v54 }
  0xb8   :  { %1246 = vmatpush3.msra.mxu1 %v1383_v10  ;;  %1156 = vmatpush3.msra.mxu0 %v2077_v41  ;;  %v2082_v10 = vld [vmem:[#allocation24_spill] sm:$0xff] }
  0xb9   :  { %1247 = vmatprep.subr.mxu1 %v1385_v14  ;;  %1157 = vmatprep.subr.mxu0 %v2078_v40  ;;  %v2083_v14 = vld [vmem:[#allocation8_spill] sm:$0xff] }
  0xba   :  { %1248 = vmatpush3.msra.mxu1 %v1387_v15  ;;  %1158 = vmatpush3.msra.mxu0 %v2079_v0  ;;  %v2084_v15 = vand.u32 4294901760, %v2083_v14 }
  0xbb   :  { %729 = vmatmul.mubr.f32.gmra.mxu1 %v2080_v20  ;;  %1249 = vmatprep.subr.mxu1 %v1389_v16  ;;  %v2085_v16 = vand.u32 4294901760, %v1395_v21  ;;  %v2089_v21 = vand.u32 4294901760, %v1416_v30  ;;  %v2093_v30 = vand.u32 4294901760, %v1475_v5  ;;  %v2103_v5 = vand.u32 4294901760, %v2069_v44 }
  0xbc   :  { %1159 = vmatprep.subr.mxu0 %v1649_v38  ;;  %1250 = vmatpush3.msra.mxu1 %v1397_v22  ;;  %v2086_v22 = vand.u32 4294901760, %v1403_v24  ;;  %v2090_v24 = vand.u32 4294901760, %v1419_v31  ;;  %v2094_v31 = vand.u32 4294901760, %v1483_v8 }
  0xbd   :  { %1051 = vmatprep.mubr.msk.f32.mxu1 %vm1707_vm9, %v2081_v9  ;;  %1160 = vmatpush3.msra.mxu0 %v1657_v39 }
  0xbe   :  { %1251 = vmatprep.subr.mxu1 %v1399_v23  ;;  %1161 = vmatprep.subr.mxu0 %v1660_v28  ;;  %v2087_v23 = vand.u32 4294901760, %v1406_v25  ;;  %v2091_v25 = vand.u32 4294901760, %v1426_v35  ;;  %v2095_v35 = vand.u32 4294901760, %v1486_v11  ;;  %v2108_v11 = vld [vmem:[#allocation17_spill] sm:$0xff] }
  0xbf   :  { %1252 = vmatpush3.msra.mxu1 %v1411_v27  ;;  %1162 = vmatpush3.msra.mxu0 %v2082_v10  ;;  %v2088_v27 = vand.u32 4294901760, %v1409_v26  ;;  %v2092_v26 = vand.u32 4294901760, %v1472_v4  ;;  %v2102_v4 = vand.u32 4294901760, %v2068_v55 }
  0xc0   :  { %1253 = vmatprep.subr.mxu1 %v1460_v61  ;;  %601 = vmatmul.mubr.f32.vlgmr.msra.gmra.mxu0 %v1715_v32  ;;  %v2096_v61 = vand.u32 4294901760, %v1489_v12  ;;  %v2109_v12 = vand.u32 4294901760, %v2108_v11 }
  0xc1   :  { %1207 = vmatprep.subr.mxu0 %v2084_v15  ;;  %1254 = vmatpush3.msra.mxu1 %v1462_v62  ;;  %v2097_v62 = vand.u32 4294901760, %v1497_v19 }
  0xc2   :  { %607 = vmatprep.mubr.f32.mxu0 %v1743_v42  ;;  %1208 = vmatpush3.msra.mxu0 %v2085_v16 }
  0xc3   :  { %1255 = vmatprep.subr.mxu1 %v1465_v1  ;;  %1209 = vmatprep.subr.mxu0 %v2086_v22  ;;  %v2098_v1 = vand.u32 4294901760, %v2063_v51 }
  0xc4   :  { %1256 = vmatpush3.msra.mxu1 %v1467_v2  ;;  %1210 = vmatpush3.msra.mxu0 %v2087_v23  ;;  %v2099_v2 = vand.u32 4294901760, %v2064_v45 }
  0xc5   :  { %1257 = vmatprep.subr.mxu1 %v1469_v3  ;;  %610 = vmatmul.mubr.f32.gmra.mxu0 %v1736_v63  ;;  %v2101_v3 = vand.u32 4294901760, %v2067_v17 }
  0xc6   :  { %1211 = vmatprep.subr.mxu0 %v2088_v27  ;;  %1258 = vmatpush3.msra.mxu1 %v1477_v6 }
  0xc7   :  { %1212 = vmatpush3.msra.mxu0 %v2089_v21  ;;  %1047 = vmatprep.mubr.msk.f32.mxu0 %vm1707_vm9, %v2081_v9 }
  0xc8   :  { %1259 = vmatprep.subr.mxu1 %v1479_v7  ;;  %1213 = vmatprep.subr.mxu0 %v2090_v24  ;;  %v2106_v7 = vld [vmem:[#allocation16_spill] sm:$0xff] }
  0xc9   :  { %1260 = vmatpush3.msra.mxu1 %v1491_v13  ;;  %1214 = vmatpush3.msra.mxu0 %v2091_v25  ;;  %v2107_v8 = vand.u32 4294901760, %v2106_v7  ;;  %v2110_v13 = vld [vmem:[#allocation18_spill] sm:$0xff] }
  0xca   :  { %1261 = vmatprep.subr.mxu1 %v1541_v47  ;;  %1215 = vmatprep.subr.mxu0 %v2092_v26 }
  0xcb   :  { %1262 = vmatpush3.msra.mxu1 %v1543_v18  ;;  %1216 = vmatpush3.msra.mxu0 %v2093_v30  ;;  %v2111_v18 = vand.u32 4294901760, %v2110_v13 }
  0xcc   :  { %1263 = vmatprep.subr.mxu1 %v1545_v49  ;;  %1217 = vmatprep.subr.mxu0 %v2094_v31  ;;  %v2115_v49 = vand.u32 4294901760, %v2077_v41 }
  0xcd   :  { %1264 = vmatpush3.msra.mxu1 %v1547_v50  ;;  %1218 = vmatpush3.msra.mxu0 %v2095_v35  ;;  %v2116_v50 = vand.u32 4294901760, %v2078_v40 }
  0xce   :  { %1265 = vmatprep.subr.mxu1 %v1549_v43  ;;  %1219 = vmatprep.subr.mxu0 %v2096_v61  ;;  %v2100_v43 = vand.u32 4294901760, %v2065_v58 }
  0xcf   :  { %1266 = vmatpush3.msra.mxu1 %v1557_v56  ;;  %1220 = vmatpush3.msra.mxu0 %v2097_v62  ;;  %v2117_v56 = vand.u32 4294901760, %v2079_v0 }
  0xd0   :  { %1267 = vmatprep.subr.mxu1 %v1559_v57  ;;  %1221 = vmatprep.subr.mxu0 %v2098_v1 }
  0xd1   :  { %1268 = vmatpush3.msra.mxu1 %v1571_v52  ;;  %1222 = vmatpush3.msra.mxu0 %v2099_v2  ;;  %v2119_v52 = vand.u32 4294901760, %v1649_v38 }
  0xd2   :  { %1269 = vmatprep.subr.mxu1 %v1621_v34  ;;  %1223 = vmatprep.subr.mxu0 %v2100_v43  ;;  %v2104_v34 = vld [vmem:[#allocation15_spill] sm:$0xff] }
  0xd3   :  { %1270 = vmatpush3.msra.mxu1 %v2066_v46  ;;  %1224 = vmatpush3.msra.mxu0 %v2101_v3  ;;  %v2105_v6 = vand.u32 4294901760, %v2104_v34 }
  0xd4   :  { %1271 = vmatprep.subr.mxu1 %v1625_v37  ;;  %1225 = vmatprep.subr.mxu0 %v2102_v4  ;;  %v2120_v37 = vand.u32 4294901760, %v1657_v39 }
  0xd5   :  { %1272 = vmatpush3.msra.mxu1 %v1627_v53  ;;  %1226 = vmatpush3.msra.mxu0 %v2103_v5  ;;  %v2121_v53 = vand.u32 4294901760, %v1660_v28 }
  0xd6   :  { %1273 = vmatprep.subr.mxu1 %v1629_v36  ;;  %1227 = vmatprep.subr.mxu0 %v2105_v6  ;;  %v2113_v36 = vand.u32 4294901760, %v2075_v29 }
  0xd7   :  { %1274 = vmatpush3.msra.mxu1 %v1637_v59  ;;  %1228 = vmatpush3.msra.mxu0 %v2107_v8  ;;  %v2122_v59 = vand.u32 4294901760, %v2082_v10 }
  0xd8   :  { %1275 = vmatprep.subr.mxu1 %v1639_v60  ;;  %1229 = vmatprep.subr.mxu0 %v2109_v12 }
  0xd9   :  { %1276 = vmatpush3.msra.mxu1 %v1651_v33  ;;  %1230 = vmatpush3.msra.mxu0 %v2111_v18 }
  0xda   :  { %1052 = vmatmul.mubr.msk.f32.vlgmr.msra.gmra.mxu1 %vm1703_vm7, %v2081_v9  ;;  %1231 = vmatprep.subr.mxu0 %v2113_v36 }
  0xdb   :  { %1053 = vmatprep.mubr.msk.f32.mxu1 %vm1725_vm11, %v2081_v9  ;;  %1232 = vmatpush3.msra.mxu0 %v2115_v49 }
  0xdc   :  { %1233 = vmatprep.subr.mxu0 %v2116_v50 }
  0xdd   :  { %1234 = vmatpush3.msra.mxu0 %v2117_v56 }
  0xde   :  { %1054 = vmatmul.mubr.msk.f32.gmra.mxu1 %vm1721_vm10, %v2081_v9  ;;  %1235 = vmatprep.subr.mxu0 %v2119_v52 }
  0xdf   :  { %1236 = vmatpush3.msra.mxu0 %v2120_v37 }
  0xe0   :  { %1237 = vmatprep.subr.mxu0 %v2121_v53 }
  0xe1   :  { %1238 = vmatpush3.msra.mxu0 %v2122_v59 }
  0xe2   :  { %1048 = vmatmul.mubr.msk.f32.vlgmr.msra.gmra.mxu0 %vm1703_vm7, %v2081_v9 }
  0xe3   :  { %1049 = vmatprep.mubr.msk.f32.mxu0 %vm1725_vm11, %v2081_v9 }
  0xe6   :  { %1050 = vmatmul.mubr.msk.f32.gmra.mxu0 %vm1721_vm10, %v2081_v9 }
 0x154   :  { %v1125_v60 = vpop.f32.mrf.mxu1 }
 0x156   :  { %v1126_v38 = vpop.f32.mrf.mxu1 }
 0x157   :  { %v1127_v17 = vadd.f32 %v1126_v38, %v1125_v60 }
 0x158   :  { %v1128_v39 = vpop.f32.mrf.mxu1 }
 0x15a   :  { %v1129_v48 = vpop.f32.mrf.mxu1 }
 0x15b   :  { %v1130_v9 = vadd.f32 %v1129_v48, %v1128_v39 }
 0x15d   :  { %v1087_v33 = vpop.f32.mrf.mxu0 }
 0x15f   :  { %v1088_v28 = vpop.f32.mrf.mxu0 }
 0x160   :  { %v1089_v58 = vadd.f32 %v1088_v28, %v1087_v33 }
 0x162   :  { %v1090_v29 = vpop.f32.mrf.mxu0  ;;  %v458_v54 = vadd.f32 %v1127_v17, %v1089_v58 }
 0x164   :  { %v1091_v41 = vpop.f32.mrf.mxu0 }
 0x165   :  { %v1092_v20 = vadd.f32 %v1091_v41, %v1090_v29 }
 0x167   :  { %v465_v22 = vadd.f32 %v1130_v9, %v1092_v20 }
 0x176   :  { %v1201_v32 = vpop.f32.mrf.mxu1 }
 0x178   :  { %v1202_v63 = vpop.f32.mrf.mxu1 }
 0x179   :  { %v1203_v23 = vadd.f32 %v1202_v63, %v1201_v32 }
 0x17b   :  { %v1204_v40 = vpop.f32.mrf.mxu1 }
 0x17d   :  { %v1205_v51 = vpop.f32.mrf.mxu1 }
 0x17e   :  { %v1206_v31 = vadd.f32 %v1205_v51, %v1204_v40 }
 0x180   :  { %v1163_v42 = vpop.f32.mrf.mxu0 }
 0x182   :  { %v1164_v0 = vpop.f32.mrf.mxu0 }
 0x183   :  { %v1165_v55 = vadd.f32 %v1164_v0, %v1163_v42 }
 0x185   :  { %v1166_v45 = vpop.f32.mrf.mxu0  ;;  %v603_v14 = vadd.f32 %v1165_v55, %v458_v54 }
 0x187   :  { %v1167_v44 = vpop.f32.mrf.mxu0  ;;  %v720_v25 = vadd.f32 %v1203_v23, %v603_v14 }
 0x188   :  { %v1168_v15 = vadd.f32 %v1167_v44, %v1166_v45 }
 0x18a   :  { %v612_v24 = vadd.f32 %v1168_v15, %v465_v22 }
 0x18c   :  { %v731_v43 = vadd.f32 %v1206_v31, %v612_v24 }
 0x19a   :  { %v1277_v46 = vpop.f32.mrf.mxu1 }
 0x19c   :  { %v1278_v10 = vpop.f32.mrf.mxu1 }
 0x19d   :  { %v1279_v35 = vadd.f32 %v1278_v10, %v1277_v46 }
 0x19e   :  { %v1280_v27 = vpop.f32.mrf.mxu1 }
 0x1a0   :  { %v1281_v62 = vpop.f32.mrf.mxu1 }
 0x1a1   :  { %v1282_v4 = vadd.f32 %v1281_v62, %v1280_v27 }
 0x1a2   :  { %v1239_v16 = vpop.f32.mrf.mxu0 }
 0x1a4   :  { %v1240_v21 = vpop.f32.mrf.mxu0 }
 0x1a5   :  { %v1241_v26 = vadd.f32 %v1240_v21, %v1239_v16 }
 0x1a6   :  { %v1242_v30 = vpop.f32.mrf.mxu0 }
 0x1a7   :  { %v899_v61 = vadd.f32 %v1241_v26, %v720_v25 }
 0x1a8   :  { %v1243_v1 = vpop.f32.mrf.mxu0 }
 0x1a9   :  { %v1010_v2 = vadd.f32 %v1279_v35, %v899_v61  ;;  %v1244_v3 = vadd.f32 %v1243_v1, %v1242_v30 }
 0x1ab   :  { %1020 = vst [vmem:[#allocation5] sm:$0xff] %v1010_v2  ;;  %v906_v5 = vadd.f32 %v1244_v3, %v731_v43 }
 0x1ad   :  { %v1017_v34 = vadd.f32 %v1282_v4, %v906_v5 }
 0x1af   :  { %1021 = vst [vmem:[#allocation5 + $0x8] sm:$0xff] %v1017_v34 }
 0x1b0   :  { %1323 = shalt.err (!%p1320_p9)
}
 0x1b1   :  { %1033 = dma.vmem_to_hbm [thread:$0]  %s1028_s1, 256, %s1958_s3, [#allocation4], %s1337_s15, %s1337_s15, %s1338_s16  }
 0x1b2   :  { %1334 = dma.done.wait [#allocation4], 256  }
 0x1b3   :  { %1335 = vsyncadd [#allocation4], 4294967040 }
 0x1b4   :  { %1037 = vsyncpa [#allocation3], 1 }
 0x1b5   :  { %1038 = vsyncpa [#allocation4], 1 }

// kernel: tpu_custom_call.1
= control target key start
LH: loop header
LB: loop body
LE: loop exit
PB: predicated region body
PF: predicated region fallthrough
CT: control target
= control target key end

     0   :  { %8 = vsyncpa [#allocation3], 0  ;;  %s1955_s0 = inlined_call_operand.vmem [shape: s32[16,1], index: 0, kind: input, shape index: {}]   ;;  %s1956_s1 = inlined_call_operand.vmem [shape: s32[16,1], index: 1, kind: input, shape index: {}]   ;;  %s1957_s2 = inlined_call_operand.hbm [shape: f32[256,128], index: 2, kind: input, shape index: {}]   ;;  %s1958_s3 = inlined_call_operand.hbm [shape: f32[16,128], index: 3, kind: output, shape index: {}]  }
   0x1   :  { %9 = vsyncpa [#allocation4], 0  ;;  %s1336_s12 = smov [#allocation2]  }
   0x2   :  { %s19_s13 = sshll.u32 %s1336_s12, 4  ;;  %s20_s13 = int_to_ptr.vmem [resolvable:$true] %s19_s13 }
   0x3   :  { %s1300_s14 = scalar_lea.vmem %s20_s13, 4096  ;;  %p1305_p1 = scmp.lt.s32.totalorder %s20_s13, %s20_s13 }
   0x4   :  { %p1301_p0 = scmp.ne.s32.totalorder %s20_s13, %s1300_s14  ;;  %p1306_p2 = scmp.lt.s32.totalorder %s1300_s14, %s1300_s14 }
   0x6   :  { %p1307_p3 = por %p1306_p2, %p1305_p1 }
   0x8   :  { %p1308_p4 = pnand %p1307_p3, %p1301_p0 }
   0xa   :  { %1311 = shalt.err (!%p1308_p4)
}
   0xb   :  { %s1337_s15 = smov 128   ;;  %s1338_s16 = smov 8  }
   0xc   :  { %25 = dma.hbm_to_vmem [thread:$0]  %s1957_s2, 4096, %s20_s13, [#allocation3], %s1337_s15, %s1337_s15, %s1338_s16  }
   0xd   :  { %1332 = dma.done.wait [#allocation3], 4096  }
   0xe   :  { %1333 = vsyncadd [#allocation3], 4294963200  ;;  %v1339_v0 = vmov 0   ;;  %v32_v1 = vld [vmem:[%s1955_s0] sm:$0xff]  ;;  %v33_v2 = vld [vmem:[%s1955_s0 + $0x8] sm:$0xff]  ;;  %s1342_s0 = smov [#allocation5]  }
   0xf   :  { %1290 = vset.pattern.permute.xlu0 %v1339_v0  ;;  %1291 = vset.pattern.permute.xlu1 %v1339_v0  ;;  %v34_v3 = vld [vmem:[%s1956_s1] sm:$0xff]  ;;  %v35_v5 = vld [vmem:[%s1956_s1 + $0x8] sm:$0xff]  ;;  %v101_v6 = vld [vmem:[#allocation2 + $0xf8] sm:$0xff]  ;;  %s1027_s1 = sshll.u32 %s1342_s0, 4  ;;  %s1028_s1 = int_to_ptr.vmem [resolvable:$true] %s1027_s1 }
  0x10   :  { %39 = vperm.xlu0 %1290, %v32_v1   ;;  %42 = vperm.xlu1 %1291, %v33_v2   ;;  %v36_v4 = vadd.s32 64, %v34_v3  ;;  %v85_v7 = vld [vmem:[#allocation2 + $0x78] sm:$0xff]  ;;  %v37_v8 = vadd.s32 64, %v35_v5  ;;  %v1381_v9 = vand.u32 4294901760, %v101_v6  ;;  %v100_v11 = vld [vmem:[#allocation2 + $0xf0] sm:$0xff]  ;;  %v99_v13 = vld [vmem:[#allocation2 + $0xe8] sm:$0xff]  ;;  %p1317_p6 = scmp.lt.s32.totalorder %s1028_s1, %s1028_s1 }
  0x11   :  { %v1383_v10 = vand.u32 4294901760, %v85_v7  ;;  %v84_v12 = vld [vmem:[#allocation2 + $0x70] sm:$0xff]  ;;  %v1385_v14 = vand.u32 4294901760, %v100_v11  ;;  %v1389_v16 = vand.u32 4294901760, %v99_v13  ;;  %v83_v17 = vld [vmem:[#allocation2 + $0x68] sm:$0xff]  ;;  %v98_v18 = vld [vmem:[#allocation2 + $0xe0] sm:$0xff] }
  0x12   :  { %v1387_v15 = vand.u32 4294901760, %v84_v12  ;;  %v82_v19 = vld [vmem:[#allocation2 + $0x60] sm:$0xff]  ;;  %v1392_v20 = vsub.f32 %v101_v6, %v1381_v9  ;;  %v1397_v22 = vand.u32 4294901760, %v83_v17  ;;  %v1399_v23 = vand.u32 4294901760, %v98_v18  ;;  %1055 = vmatprep.subr.mxu0 %v1381_v9  ;;  %v97_v44 = vld [vmem:[#allocation2 + $0xd8] sm:$0xff]  ;;  %v96_v50 = vld [vmem:[#allocation2 + $0xd0] sm:$0xff] }
  0x13   :  { %v1395_v21 = vsub.f32 %v85_v7, %v1383_v10  ;;  %v1403_v24 = vsub.f32 %v100_v11, %v1385_v14  ;;  %v1409_v26 = vsub.f32 %v99_v13, %v1389_v16  ;;  %v1411_v27 = vand.u32 4294901760, %v82_v19  ;;  %1056 = vmatpush3.msra.mxu0 %v1383_v10  ;;  %v81_v45 = vld [vmem:[#allocation2 + $0x58] sm:$0xff]  ;;  %v80_v51 = vld [vmem:[#allocation2 + $0x50] sm:$0xff]  ;;  %v95_v52 = vld [vmem:[#allocation2 + $0xc8] sm:$0xff]  ;;  %s1312_s26 = scalar_lea.vmem %s1028_s1, 256 }
  0x14   :  { %2030 = vst [vmem:[#allocation8_spill] sm:$0xff] %v1392_v20  ;;  %49 = vperm.xlu0 %1290, %v36_v4   ;;  %52 = vperm.xlu1 %1291, %v37_v8   ;;  %v1406_v25 = vsub.f32 %v84_v12, %v1387_v15  ;;  %v1978_v28 = vand.u32 4294901760, %v1392_v20  ;;  %v1416_v30 = vsub.f32 %v83_v17, %v1397_v22  ;;  %v79_v57 = vld [vmem:[#allocation2 + $0x48] sm:$0xff]  ;;  %v94_v58 = vld [vmem:[#allocation2 + $0xc0] sm:$0xff]  ;;  %v1460_v61 = vand.u32 4294901760, %v97_v44  ;;  %p1313_p5 = scmp.ne.s32.totalorder %s1028_s1, %s1312_s26  ;;  %p1318_p7 = scmp.lt.s32.totalorder %s1312_s26, %s1312_s26 }
  0x15   :  { %v1975_v29 = vand.u32 4294901760, %v1395_v21  ;;  %v1419_v31 = vsub.f32 %v98_v18, %v1399_v23  ;;  %v1974_v32 = vand.u32 4294901760, %v1403_v24  ;;  %v1970_v34 = vand.u32 4294901760, %v1409_v26  ;;  %1057 = vmatprep.subr.mxu0 %v1385_v14  ;;  %v78_v63 = vld [vmem:[#allocation2 + $0x40] sm:$0xff] }
  0x16   :  { %v1973_v33 = vand.u32 4294901760, %v1406_v25  ;;  %v1426_v35 = vsub.f32 %v82_v19, %v1411_v27  ;;  %v345_v36 = vsub.f32 %v1392_v20, %v1978_v28  ;;  %v1969_v38 = vand.u32 4294901760, %v1416_v30  ;;  %1058 = vmatpush3.msra.mxu0 %v1387_v15  ;;  %v88_v28 = vld [vmem:[#allocation2 + $0x90] sm:$0xff]  ;;  %p1319_p8 = por %p1318_p7, %p1317_p6 }
  0x17   :  { %v233_v37 = vsub.f32 %v1395_v21, %v1975_v29  ;;  %v1968_v39 = vand.u32 4294901760, %v1419_v31  ;;  %v352_v40 = vsub.f32 %v1403_v24, %v1974_v32  ;;  %v359_v42 = vsub.f32 %v1409_v26, %v1970_v34  ;;  %1059 = vmatprep.subr.mxu0 %v1389_v16  ;;  %v73_v32 = vld [vmem:[#allocation2 + $0x18] sm:$0xff] }
  0x18   :  { %v240_v41 = vsub.f32 %v1406_v25, %v1973_v33  ;;  %v1966_v43 = vand.u32 4294901760, %v1426_v35  ;;  %v346_v46 = vand.u32 4294901760, %v345_v36  ;;  %v247_v48 = vsub.f32 %v1416_v30, %v1969_v38  ;;  %1060 = vmatpush3.msra.mxu0 %v1397_v22  ;;  %v89_v33 = vld [vmem:[#allocation2 + $0x98] sm:$0xff]  ;;  %p1320_p9 = pnand %p1319_p8, %p1313_p5 }
  0x19   :  { %v234_v47 = vand.u32 4294901760, %v233_v37  ;;  %v366_v49 = vsub.f32 %v1419_v31, %v1968_v39  ;;  %v353_v53 = vand.u32 4294901760, %v352_v40  ;;  %v360_v55 = vand.u32 4294901760, %v359_v42  ;;  %1061 = vmatprep.subr.mxu0 %v1399_v23 }
  0x1a   :  { %v241_v54 = vand.u32 4294901760, %v240_v41  ;;  %v254_v56 = vsub.f32 %v1426_v35, %v1966_v43  ;;  %1093 = vmatprep.subr.mxu1 %v346_v46  ;;  %v248_v59 = vand.u32 4294901760, %v247_v48  ;;  %v1462_v62 = vand.u32 4294901760, %v81_v45  ;;  %1062 = vmatpush3.msra.mxu0 %v1411_v27 }
  0x1b   :  { %v367_v60 = vand.u32 4294901760, %v366_v49  ;;  %1094 = vmatpush3.msra.mxu1 %v234_v47  ;;  %v1465_v1 = vand.u32 4294901760, %v96_v50  ;;  %v1467_v2 = vand.u32 4294901760, %v80_v51  ;;  %v1469_v3 = vand.u32 4294901760, %v95_v52  ;;  %1063 = vmatprep.subr.mxu0 %v1460_v61 }
  0x1c   :  { %v255_v0 = vand.u32 4294901760, %v254_v56  ;;  %1095 = vmatprep.subr.mxu1 %v353_v53  ;;  %v1472_v4 = vsub.f32 %v97_v44, %v1460_v61  ;;  %v1475_v5 = vsub.f32 %v81_v45, %v1462_v62  ;;  %v1477_v6 = vand.u32 4294901760, %v79_v57  ;;  %1064 = vmatpush3.msra.mxu0 %v1462_v62  ;;  %v77_v53 = vld [vmem:[#allocation2 + $0x38] sm:$0xff] }
  0x1d   :  { %v1479_v7 = vand.u32 4294901760, %v94_v58  ;;  %1096 = vmatpush3.msra.mxu1 %v241_v54  ;;  %v1483_v8 = vsub.f32 %v96_v50, %v1465_v1  ;;  %v1486_v11 = vsub.f32 %v80_v51, %v1467_v2  ;;  %v1489_v12 = vsub.f32 %v95_v52, %v1469_v3  ;;  %1065 = vmatprep.subr.mxu0 %v1465_v1  ;;  %v93_v52 = vld [vmem:[#allocation2 + $0xb8] sm:$0xff] }
  0x1e   :  { %v1491_v13 = vand.u32 4294901760, %v78_v63  ;;  %1097 = vmatprep.subr.mxu1 %v360_v55  ;;  %v1965_v17 = vand.u32 4294901760, %v1472_v4  ;;  %v1964_v18 = vand.u32 4294901760, %v1475_v5  ;;  %v1497_v19 = vsub.f32 %v79_v57, %v1477_v6  ;;  %1066 = vmatpush3.msra.mxu0 %v1467_v2 }
  0x1f   :  { %v1500_v36 = vsub.f32 %v94_v58, %v1479_v7  ;;  %1098 = vmatpush3.msra.mxu1 %v248_v59  ;;  %v1962_v37 = vand.u32 4294901760, %v1483_v8  ;;  %v1960_v40 = vand.u32 4294901760, %v1486_v11  ;;  %v1959_v41 = vand.u32 4294901760, %v1489_v12  ;;  %1067 = vmatprep.subr.mxu0 %v1469_v3  ;;  %v92_v58 = vld [vmem:[#allocation2 + $0xb0] sm:$0xff] }
  0x20   :  { %v1507_v42 = vsub.f32 %v78_v63, %v1491_v13  ;;  %1099 = vmatprep.subr.mxu1 %v367_v60  ;;  %v373_v44 = vsub.f32 %v1472_v4, %v1965_v17  ;;  %v261_v45 = vsub.f32 %v1475_v5, %v1964_v18  ;;  %v1961_v46 = vand.u32 4294901760, %v1497_v19  ;;  %1068 = vmatpush3.msra.mxu0 %v1477_v6  ;;  %v76_v59 = vld [vmem:[#allocation2 + $0x30] sm:$0xff]  ;;  %v91_v60 = vld [vmem:[#allocation2 + $0xa8] sm:$0xff]  ;;  %v74_v17 = vld [vmem:[#allocation2 + $0x20] sm:$0xff] }
  0x21   :  { %2031 = vst [vmem:[#allocation9_spill] sm:$0xff] %v1500_v36  ;;  %v1963_v47 = vand.u32 4294901760, %v1500_v36  ;;  %1100 = vmatpush3.msra.mxu1 %v255_v0  ;;  %v380_v48 = vsub.f32 %v1483_v8, %v1962_v37  ;;  %v268_v49 = vsub.f32 %v1486_v11, %v1960_v40  ;;  %v387_v50 = vsub.f32 %v1489_v12, %v1959_v41  ;;  %v90_v40 = vld [vmem:[#allocation2 + $0xa0] sm:$0xff] }
  0x22   :  { %2032 = vst [vmem:[#allocation10_spill] sm:$0xff] %v1507_v42  ;;  %v1967_v51 = vand.u32 4294901760, %v1507_v42  ;;  %v374_v54 = vand.u32 4294901760, %v373_v44  ;;  %v262_v55 = vand.u32 4294901760, %v261_v45  ;;  %v275_v56 = vsub.f32 %v1497_v19, %v1961_v46  ;;  %1069 = vmatprep.subr.mxu0 %v1479_v7  ;;  %v75_v45 = vld [vmem:[#allocation2 + $0x28] sm:$0xff] }
  0x23   :  { %v394_v57 = vsub.f32 %v1500_v36, %v1963_v47  ;;  %v381_v63 = vand.u32 4294901760, %v380_v48  ;;  %v269_v0 = vand.u32 4294901760, %v268_v49  ;;  %v388_v41 = vand.u32 4294901760, %v387_v50  ;;  %1070 = vmatpush3.msra.mxu0 %v1491_v13 }
  0x24   :  { %v282_v44 = vsub.f32 %v1507_v42, %v1967_v51  ;;  %1101 = vmatprep.subr.mxu1 %v374_v54  ;;  %v276_v46 = vand.u32 4294901760, %v275_v56  ;;  %v1541_v47 = vand.u32 4294901760, %v93_v52  ;;  %v1543_v18 = vand.u32 4294901760, %v77_v53  ;;  %v70_v42 = vld [vmem:[#allocation2] sm:$0xff] }
  0x25   :  { %v395_v37 = vand.u32 4294901760, %v394_v57  ;;  %1102 = vmatpush3.msra.mxu1 %v262_v55  ;;  %v1545_v49 = vand.u32 4294901760, %v92_v58  ;;  %v1547_v50 = vand.u32 4294901760, %v76_v59  ;;  %v1549_v43 = vand.u32 4294901760, %v91_v60 }
  0x26   :  { %v283_v48 = vand.u32 4294901760, %v282_v44  ;;  %1103 = vmatprep.subr.mxu1 %v381_v63  ;;  %v1552_v51 = vsub.f32 %v93_v52, %v1541_v47  ;;  %v1555_v54 = vsub.f32 %v77_v53, %v1543_v18  ;;  %v1557_v56 = vand.u32 4294901760, %v75_v45  ;;  %1071 = vmatprep.subr.mxu0 %v1541_v47 }
  0x27   :  { %v1559_v57 = vand.u32 4294901760, %v90_v40  ;;  %1104 = vmatpush3.msra.mxu1 %v269_v0  ;;  %v1563_v55 = vsub.f32 %v92_v58, %v1545_v49  ;;  %v1566_v44 = vsub.f32 %v76_v59, %v1547_v50  ;;  %v1569_v63 = vsub.f32 %v91_v60, %v1549_v43  ;;  %1072 = vmatpush3.msra.mxu0 %v1543_v18 }
  0x28   :  { %2033 = vst [vmem:[#allocation11_spill] sm:$0xff] %v1552_v51  ;;  %2034 = vst [vmem:[#allocation12_spill] sm:$0xff] %v1555_v54  ;;  %v1571_v52 = vand.u32 4294901760, %v74_v17  ;;  %1105 = vmatprep.subr.mxu1 %v388_v41  ;;  %v1971_v53 = vand.u32 4294901760, %v1552_v51  ;;  %v1972_v39 = vand.u32 4294901760, %v1555_v54  ;;  %v1577_v0 = vsub.f32 %v75_v45, %v1557_v56  ;;  %1073 = vmatprep.subr.mxu0 %v1545_v49 }
  0x29   :  { %2035 = vst [vmem:[#allocation13_spill] sm:$0xff] %v1563_v55  ;;  %2036 = vst [vmem:[#allocation14_spill] sm:$0xff] %v1566_v44  ;;  %v1580_v58 = vsub.f32 %v90_v40, %v1559_v57  ;;  %1106 = vmatpush3.msra.mxu1 %v276_v46  ;;  %v1976_v59 = vand.u32 4294901760, %v1563_v55  ;;  %v1977_v60 = vand.u32 4294901760, %v1566_v44  ;;  %v1983_v38 = vand.u32 4294901760, %v1569_v63  ;;  %1074 = vmatpush3.msra.mxu0 %v1547_v50 }
  0x2a   :  { %2037 = vst [vmem:[#allocation15_spill] sm:$0xff] %v1569_v63  ;;  %2038 = vst [vmem:[#allocation16_spill] sm:$0xff] %v1577_v0  ;;  %v1587_v41 = vsub.f32 %v74_v17, %v1571_v52  ;;  %1107 = vmatprep.subr.mxu1 %v395_v37  ;;  %v401_v40 = vsub.f32 %v1552_v51, %v1971_v53  ;;  %v289_v46 = vsub.f32 %v1555_v54, %v1972_v39  ;;  %v86_v51 = vld [vmem:[#allocation2 + $0x80] sm:$0xff] }
  0x2b   :  { %2039 = vst [vmem:[#allocation17_spill] sm:$0xff] %v1580_v58  ;;  %v1990_v45 = vand.u32 4294901760, %v1577_v0  ;;  %v1993_v34 = vand.u32 4294901760, %v1580_v58  ;;  %1075 = vmatprep.subr.mxu0 %v1549_v43  ;;  %1108 = vmatpush3.msra.mxu1 %v283_v48  ;;  %v408_v17 = vsub.f32 %v1563_v55, %v1976_v59  ;;  %v296_v37 = vsub.f32 %v1566_v44, %v1977_v60  ;;  %v72_v44 = vld [vmem:[#allocation2 + $0x10] sm:$0xff]  ;;  %v87_v55 = vld [vmem:[#allocation2 + $0x88] sm:$0xff] }
  0x2c   :  { %2040 = vst [vmem:[#allocation18_spill] sm:$0xff] %v1587_v41  ;;  %v415_v53 = vsub.f32 %v1569_v63, %v1983_v38  ;;  %1076 = vmatpush3.msra.mxu0 %v1557_v56  ;;  %v402_v29 = vand.u32 4294901760, %v401_v40  ;;  %v290_v48 = vand.u32 4294901760, %v289_v46  ;;  %v2041_v54 = vand.u32 4294901760, %v1587_v41  ;;  %v71_v46 = vld [vmem:[#allocation2 + $0x8] sm:$0xff] }
  0x2d   :  { %v303_v59 = vsub.f32 %v1577_v0, %v1990_v45  ;;  %v422_v60 = vsub.f32 %v1580_v58, %v1993_v34  ;;  %1077 = vmatprep.subr.mxu0 %v1559_v57  ;;  %v409_v38 = vand.u32 4294901760, %v408_v17  ;;  %v297_v39 = vand.u32 4294901760, %v296_v37 }
  0x2e   :  { %v416_v63 = vand.u32 4294901760, %v415_v53  ;;  %v310_v40 = vsub.f32 %v1587_v41, %v2041_v54  ;;  %1078 = vmatpush3.msra.mxu0 %v1571_v52  ;;  %1109 = vmatprep.subr.mxu1 %v402_v29  ;;  %v1621_v34 = vand.u32 4294901760, %v89_v33  ;;  %v1623_v58 = vand.u32 4294901760, %v73_v32 }
  0x2f   :  { %v304_v45 = vand.u32 4294901760, %v303_v59  ;;  %v423_v0 = vand.u32 4294901760, %v422_v60  ;;  %1110 = vmatpush3.msra.mxu1 %v290_v48  ;;  %v1625_v37 = vand.u32 4294901760, %v88_v28  ;;  %v1627_v53 = vand.u32 4294901760, %v72_v44 }
  0x30   :  { %2042 = vst [vmem:[#allocation19_spill] sm:$0xff] %v1623_v58  ;;  %v311_v17 = vand.u32 4294901760, %v310_v40  ;;  %v1629_v36 = vand.u32 4294901760, %v87_v55  ;;  %1111 = vmatprep.subr.mxu1 %v409_v38  ;;  %v1632_v54 = vsub.f32 %v89_v33, %v1621_v34  ;;  %v1635_v29 = vsub.f32 %v73_v32, %v1623_v58  ;;  %1079 = vmatprep.subr.mxu0 %v1621_v34 }
  0x31   :  { %v1637_v59 = vand.u32 4294901760, %v71_v46  ;;  %v1639_v60 = vand.u32 4294901760, %v86_v51  ;;  %1112 = vmatpush3.msra.mxu1 %v297_v39  ;;  %v1643_v48 = vsub.f32 %v88_v28, %v1625_v37  ;;  %v1646_v40 = vsub.f32 %v72_v44, %v1627_v53  ;;  %1080 = vmatpush3.msra.mxu0 %v1623_v58 }
  0x32   :  { %2043 = vst [vmem:[#allocation20_spill] sm:$0xff] %v1632_v54  ;;  %2044 = vst [vmem:[#allocation21_spill] sm:$0xff] %v1635_v29  ;;  %v1649_v38 = vsub.f32 %v87_v55, %v1629_v36  ;;  %v1651_v33 = vand.u32 4294901760, %v70_v42  ;;  %1113 = vmatprep.subr.mxu1 %v416_v63  ;;  %v2004_v32 = vand.u32 4294901760, %v1632_v54  ;;  %v2007_v41 = vand.u32 4294901760, %v1635_v29  ;;  %1081 = vmatprep.subr.mxu0 %v1625_v37 }
  0x33   :  { %2045 = vst [vmem:[#allocation22_spill] sm:$0xff] %v1643_v48  ;;  %2046 = vst [vmem:[#allocation23_spill] sm:$0xff] %v1646_v40  ;;  %v1657_v39 = vsub.f32 %v71_v46, %v1637_v59  ;;  %v1660_v28 = vsub.f32 %v86_v51, %v1639_v60  ;;  %1114 = vmatpush3.msra.mxu1 %v304_v45  ;;  %v2010_v55 = vand.u32 4294901760, %v1643_v48  ;;  %1082 = vmatpush3.msra.mxu0 %v1627_v53 }
  0x34   :  { %v1667_v63 = vsub.f32 %v70_v42, %v1651_v33  ;;  %1115 = vmatprep.subr.mxu1 %v423_v0  ;;  %v429_v51 = vsub.f32 %v1632_v54, %v2004_v32  ;;  %v317_v45 = vsub.f32 %v1635_v29, %v2007_v41  ;;  %1083 = vmatprep.subr.mxu0 %v1629_v36  ;;  %v2048_v0 = vand.u32 4294901760, %v1646_v40 }
  0x35   :  { %1116 = vmatpush3.msra.mxu1 %v311_v17  ;;  %v436_v42 = vsub.f32 %v1643_v48, %v2010_v55  ;;  %v2049_v32 = vand.u32 4294901760, %v1649_v38  ;;  %1084 = vmatpush3.msra.mxu0 %v1637_v59  ;;  %v2050_v17 = vand.u32 4294901760, %v1657_v39  ;;  %v2051_v55 = vand.u32 4294901760, %v1660_v28 }
  0x36   :  { %2047 = vst [vmem:[#allocation24_spill] sm:$0xff] %v1667_v63  ;;  %v324_v58 = vsub.f32 %v1646_v40, %v2048_v0  ;;  %v2015_v41 = vand.u32 4294901760, %v1667_v63  ;;  %v430_v44 = vand.u32 4294901760, %v429_v51  ;;  %v318_v46 = vand.u32 4294901760, %v317_v45  ;;  %1085 = vmatprep.subr.mxu0 %v1639_v60 }
  0x37   :  { %v443_v54 = vsub.f32 %v1649_v38, %v2049_v32  ;;  %v331_v29 = vsub.f32 %v1657_v39, %v2050_v17  ;;  %v450_v48 = vsub.f32 %v1660_v28, %v2051_v55  ;;  %v437_v0 = vand.u32 4294901760, %v436_v42  ;;  %1086 = vmatpush3.msra.mxu0 %v1651_v33 }
  0x38   :  { %v325_v40 = vand.u32 4294901760, %v324_v58  ;;  %v338_v32 = vsub.f32 %v1667_v63, %v2015_v41  ;;  %1117 = vmatprep.subr.mxu1 %v430_v44  ;;  %1131 = vmatprep.subr.mxu0 %v1392_v20  ;;  %v29_v58 = vlaneseq }
  0x39   :  { %v444_v51 = vand.u32 4294901760, %v443_v54  ;;  %1118 = vmatpush3.msra.mxu1 %v318_v46  ;;  %v332_v45 = vand.u32 4294901760, %v331_v29  ;;  %v451_v17 = vand.u32 4294901760, %v450_v48  ;;  %v2052_v29 = vmov 0 }
  0x3a   :  { %1119 = vmatprep.subr.mxu1 %v437_v0  ;;  %v339_v55 = vand.u32 4294901760, %v338_v32  ;;  %v30_v42 = vand.u32 127, %v29_v58 }
  0x3b   :  { %1120 = vmatpush3.msra.mxu1 %v325_v40  ;;  %v1340_v40 = vmov 0.0  }
  0x3c   :  { %1121 = vmatprep.subr.mxu1 %v444_v51  ;;  %v31_v44 = vadd.s32 128, %v30_v42 }
  0x3d   :  { %1122 = vmatpush3.msra.mxu1 %v332_v45  ;;  %v2060_v45 = vmov 0 }
  0x3e   :  { %1123 = vmatprep.subr.mxu1 %v451_v17 }
  0x3f   :  { %1124 = vmatpush3.msra.mxu1 %v339_v55 }
  0x40   :  { %1169 = vmatprep.subr.mxu1 %v1381_v9 }
  0x8b   :  { %v40_v41 = vpop.permute.xlu0 %39  ;;  %v43_v63 = vpop.permute.xlu1 %42 }
  0x8c   :  { %vm44_vm0 = vcmp.eq.s32.totalorder %v30_v42, %v40_v41  ;;  %vm46_vm1 = vcmp.eq.s32.totalorder %v30_v42, %v43_v63  ;;  %vm45_vm5 = vcmp.eq.s32.totalorder %v31_v44, %v40_v41  ;;  %vm47_vm6 = vcmp.eq.s32.totalorder %v31_v44, %v43_v63 }
  0x8d   :  { %v2022_v41 = vmov 1.0  }
  0x8f   :  { %v50_v54 = vpop.permute.xlu0 %49  ;;  %v53_v20 = vpop.permute.xlu1 %52 }
  0x90   :  { %vm54_vm2 = vcmp.eq.s32.totalorder %v30_v42, %v50_v54  ;;  %vm55_vm3 = vcmp.eq.s32.totalorder %v31_v44, %v50_v54  ;;  %vm56_vm4 = vcmp.eq.s32.totalorder %v30_v42, %v53_v20  ;;  %vm57_vm8 = vcmp.eq.s32.totalorder %v31_v44, %v53_v20 }
  0x91   :  { %vm1703_vm7 = vmor %vm44_vm0, %vm54_vm2  ;;  %v2057_v20 = vmov 0 }
  0x92   :  { %v2053_v29 = vsel %vm1703_vm7, 4294967295, %v2052_v29  ;;  %vm1707_vm9 = vmor %vm45_vm5, %vm55_vm3  ;;  %v1039_v46 = vsel %vm1703_vm7, 1.0, %v1340_v40 }
  0x93   :  { %2054 = vst [vmem:[#allocation25_spill] sm:$0xff] %v2053_v29  ;;  %v1040_v0 = vsel %vm1707_vm9, 1.0, %v1340_v40  ;;  %v1715_v32 = vsub.f32 %v1039_v46, %v1039_v46  ;;  %1043 = vmatprep.mubr.msk.f32.mxu1 %vm1707_vm9, %v2022_v41  ;;  %vm1721_vm10 = vmor %vm46_vm1, %vm56_vm4  ;;  %v2075_v29 = vld [vmem:[#allocation20_spill] sm:$0xff] }
  0x94   :  { %v2058_v20 = vsel %vm1721_vm10, 4294967295, %v2057_v20  ;;  %v199_v51 = vsub.f32 %v1040_v0, %v1040_v0  ;;  %vm1725_vm11 = vmor %vm47_vm6, %vm57_vm8  ;;  %v1041_v17 = vsel %vm1721_vm10, 1.0, %v1340_v40  ;;  %1044 = vmatmul.mubr.msk.f32.vlgmr.msra.gmra.mxu1 %vm1703_vm7, %v2022_v41 }
  0x95   :  { %2059 = vst [vmem:[#allocation26_spill] sm:$0xff] %v2058_v20  ;;  %v2061_v45 = vsel %vm1725_vm11, 4294967295, %v2060_v45  ;;  %v1042_v55 = vsel %vm1725_vm11, 1.0, %v1340_v40  ;;  %v1736_v63 = vsub.f32 %v1041_v17, %v1041_v17  ;;  %1170 = vmatpush3.msra.mxu1 %v1383_v10  ;;  %1045 = vmatprep.mubr.msk.f32.mxu1 %vm1725_vm11, %v2022_v41  ;;  %v2019_v58 = vand.u32 4294901760, %v1715_v32 }
  0x96   :  { %2062 = vst [vmem:[#allocation27_spill] sm:$0xff] %v2061_v45  ;;  %v1743_v42 = vsub.f32 %v1042_v55, %v1042_v55  ;;  %1171 = vmatprep.subr.mxu1 %v1385_v14  ;;  %v200_v44 = vand.u32 4294901760, %v199_v51  ;;  %v2074_v20 = vand.u32 4294901760, %v1715_v32 }
  0x97   :  { %1172 = vmatpush3.msra.mxu1 %v1387_v15  ;;  %v207_v54 = vsub.f32 %v1715_v32, %v2019_v58  ;;  %v2024_v40 = vand.u32 4294901760, %v1736_v63 }
  0x98   :  { %1173 = vmatprep.subr.mxu1 %v1389_v16  ;;  %1046 = vmatmul.mubr.msk.f32.gmra.mxu1 %vm1721_vm10, %v2022_v41  ;;  %v201_v46 = vsub.f32 %v199_v51, %v200_v44  ;;  %v2025_v0 = vand.u32 4294901760, %v1743_v42  ;;  %v2071_v41 = vld [vmem:[#allocation16_spill] sm:$0xff] }
  0x99   :  { %1174 = vmatpush3.msra.mxu1 %v1397_v22  ;;  %714 = vmatprep.mubr.f32.mxu1 %v200_v44  ;;  %v208_v17 = vand.u32 4294901760, %v207_v54  ;;  %v222_v45 = vsub.f32 %v1736_v63, %v2024_v40  ;;  %v2072_v40 = vld [vmem:[#allocation17_spill] sm:$0xff] }
  0x9a   :  { %1175 = vmatprep.subr.mxu1 %v1399_v23  ;;  %v202_v55 = vand.u32 4294901760, %v201_v46  ;;  %v216_v58 = vsub.f32 %v1743_v42, %v2025_v0  ;;  %v2066_v46 = vld [vmem:[#allocation19_spill] sm:$0xff]  ;;  %v2073_v0 = vld [vmem:[#allocation18_spill] sm:$0xff] }
  0x9b   :  { %1176 = vmatpush3.msra.mxu1 %v1411_v27  ;;  %v223_v54 = vand.u32 4294901760, %v222_v45  ;;  %v2064_v45 = vld [vmem:[#allocation10_spill] sm:$0xff] }
  0x9c   :  { %1177 = vmatprep.subr.mxu1 %v1460_v61  ;;  %203 = vmatprep.mubr.f32.mxu0 %v202_v55  ;;  %v217_v44 = vand.u32 4294901760, %v216_v58  ;;  %v2065_v58 = vld [vmem:[#allocation11_spill] sm:$0xff]  ;;  %v2068_v55 = vld [vmem:[#allocation13_spill] sm:$0xff] }
  0x9d   :  { %1178 = vmatpush3.msra.mxu1 %v1462_v62  ;;  %209 = vmatmul.mubr.f32.vlgmr.msra.gmra.mxu0 %v208_v17  ;;  %v2067_v17 = vld [vmem:[#allocation12_spill] sm:$0xff] }
  0x9e   :  { %1132 = vmatpush3.msra.mxu0 %v1395_v21  ;;  %1179 = vmatprep.subr.mxu1 %v1465_v1 }
  0x9f   :  { %1133 = vmatprep.subr.mxu0 %v1403_v24  ;;  %1180 = vmatpush3.msra.mxu1 %v1467_v2 }
  0xa0   :  { %1134 = vmatpush3.msra.mxu0 %v1406_v25  ;;  %1181 = vmatprep.subr.mxu1 %v1469_v3 }
  0xa1   :  { %218 = vmatprep.mubr.f32.mxu0 %v217_v44  ;;  %1135 = vmatprep.subr.mxu0 %v1409_v26  ;;  %v2069_v44 = vld [vmem:[#allocation14_spill] sm:$0xff] }
  0xa2   :  { %1182 = vmatpush3.msra.mxu1 %v1477_v6  ;;  %224 = vmatmul.mubr.f32.gmra.mxu0 %v223_v54  ;;  %v2070_v54 = vld [vmem:[#allocation15_spill] sm:$0xff] }
  0xa3   :  { %1136 = vmatpush3.msra.mxu0 %v1416_v30  ;;  %1183 = vmatprep.subr.mxu1 %v1479_v7 }
  0xa4   :  { %1137 = vmatprep.subr.mxu0 %v1419_v31  ;;  %598 = vmatprep.mubr.f32.mxu0 %v199_v51  ;;  %v2063_v51 = vld [vmem:[#allocation9_spill] sm:$0xff] }
  0xa5   :  { %1184 = vmatpush3.msra.mxu1 %v1491_v13  ;;  %1138 = vmatpush3.msra.mxu0 %v1426_v35 }
  0xa6   :  { %1185 = vmatprep.subr.mxu1 %v1541_v47  ;;  %1139 = vmatprep.subr.mxu0 %v1472_v4 }
  0xa7   :  { %1186 = vmatpush3.msra.mxu1 %v1543_v18  ;;  %1140 = vmatpush3.msra.mxu0 %v1475_v5 }
  0xa8   :  { %1187 = vmatprep.subr.mxu1 %v1545_v49  ;;  %1141 = vmatprep.subr.mxu0 %v1483_v8 }
  0xa9   :  { %1188 = vmatpush3.msra.mxu1 %v1547_v50  ;;  %1142 = vmatpush3.msra.mxu0 %v1486_v11 }
  0xaa   :  { %1189 = vmatprep.subr.mxu1 %v1549_v43  ;;  %1143 = vmatprep.subr.mxu0 %v1489_v12 }
  0xab   :  { %1190 = vmatpush3.msra.mxu1 %v1557_v56  ;;  %1144 = vmatpush3.msra.mxu0 %v1497_v19 }
  0xac   :  { %1191 = vmatprep.subr.mxu1 %v1559_v57  ;;  %1145 = vmatprep.subr.mxu0 %v2063_v51 }
  0xad   :  { %1192 = vmatpush3.msra.mxu1 %v1571_v52  ;;  %1146 = vmatpush3.msra.mxu0 %v2064_v45 }
  0xae   :  { %1193 = vmatprep.subr.mxu1 %v1621_v34  ;;  %1147 = vmatprep.subr.mxu0 %v2065_v58 }
  0xaf   :  { %1194 = vmatpush3.msra.mxu1 %v2066_v46  ;;  %1148 = vmatpush3.msra.mxu0 %v2067_v17 }
  0xb0   :  { %1195 = vmatprep.subr.mxu1 %v1625_v37  ;;  %1149 = vmatprep.subr.mxu0 %v2068_v55 }
  0xb1   :  { %1196 = vmatpush3.msra.mxu1 %v1627_v53  ;;  %1150 = vmatpush3.msra.mxu0 %v2069_v44 }
  0xb2   :  { %1197 = vmatprep.subr.mxu1 %v1629_v36  ;;  %1151 = vmatprep.subr.mxu0 %v2070_v54  ;;  %v2076_v54 = vand.u32 4294901760, %v1743_v42 }
  0xb3   :  { %1198 = vmatpush3.msra.mxu1 %v1637_v59  ;;  %1152 = vmatpush3.msra.mxu0 %v2071_v41  ;;  %v2077_v41 = vld [vmem:[#allocation21_spill] sm:$0xff] }
  0xb4   :  { %1199 = vmatprep.subr.mxu1 %v1639_v60  ;;  %1153 = vmatprep.subr.mxu0 %v2072_v40  ;;  %v2078_v40 = vld [vmem:[#allocation22_spill] sm:$0xff] }
  0xb5   :  { %1200 = vmatpush3.msra.mxu1 %v1651_v33  ;;  %1154 = vmatpush3.msra.mxu0 %v2073_v0  ;;  %v2079_v0 = vld [vmem:[#allocation23_spill] sm:$0xff] }
  0xb6   :  { %718 = vmatmul.mubr.f32.vlgmr.msra.gmra.mxu1 %v2074_v20  ;;  %1245 = vmatprep.subr.mxu1 %v1381_v9  ;;  %v2080_v20 = vand.u32 4294901760, %v1736_v63  ;;  %v2081_v9 = vmov 1.0  }
  0xb7   :  { %1155 = vmatprep.subr.mxu0 %v2075_v29  ;;  %725 = vmatprep.mubr.f32.mxu1 %v2076_v54 }
  0xb8   :  { %1246 = vmatpush3.msra.mxu1 %v1383_v10  ;;  %1156 = vmatpush3.msra.mxu0 %v2077_v41  ;;  %v2082_v10 = vld [vmem:[#allocation24_spill] sm:$0xff] }
  0xb9   :  { %1247 = vmatprep.subr.mxu1 %v1385_v14  ;;  %1157 = vmatprep.subr.mxu0 %v2078_v40  ;;  %v2083_v14 = vld [vmem:[#allocation8_spill] sm:$0xff] }
  0xba   :  { %1248 = vmatpush3.msra.mxu1 %v1387_v15  ;;  %1158 = vmatpush3.msra.mxu0 %v2079_v0  ;;  %v2084_v15 = vand.u32 4294901760, %v2083_v14 }
  0xbb   :  { %729 = vmatmul.mubr.f32.gmra.mxu1 %v2080_v20  ;;  %1249 = vmatprep.subr.mxu1 %v1389_v16  ;;  %v2085_v16 = vand.u32 4294901760, %v1395_v21  ;;  %v2089_v21 = vand.u32 4294901760, %v1416_v30  ;;  %v2093_v30 = vand.u32 4294901760, %v1475_v5  ;;  %v2103_v5 = vand.u32 4294901760, %v2069_v44 }
  0xbc   :  { %1159 = vmatprep.subr.mxu0 %v1649_v38  ;;  %1250 = vmatpush3.msra.mxu1 %v1397_v22  ;;  %v2086_v22 = vand.u32 4294901760, %v1403_v24  ;;  %v2090_v24 = vand.u32 4294901760, %v1419_v31  ;;  %v2094_v31 = vand.u32 4294901760, %v1483_v8 }
  0xbd   :  { %1051 = vmatprep.mubr.msk.f32.mxu1 %vm1707_vm9, %v2081_v9  ;;  %1160 = vmatpush3.msra.mxu0 %v1657_v39 }
  0xbe   :  { %1251 = vmatprep.subr.mxu1 %v1399_v23  ;;  %1161 = vmatprep.subr.mxu0 %v1660_v28  ;;  %v2087_v23 = vand.u32 4294901760, %v1406_v25  ;;  %v2091_v25 = vand.u32 4294901760, %v1426_v35  ;;  %v2095_v35 = vand.u32 4294901760, %v1486_v11  ;;  %v2108_v11 = vld [vmem:[#allocation17_spill] sm:$0xff] }
  0xbf   :  { %1252 = vmatpush3.msra.mxu1 %v1411_v27  ;;  %1162 = vmatpush3.msra.mxu0 %v2082_v10  ;;  %v2088_v27 = vand.u32 4294901760, %v1409_v26  ;;  %v2092_v26 = vand.u32 4294901760, %v1472_v4  ;;  %v2102_v4 = vand.u32 4294901760, %v2068_v55 }
  0xc0   :  { %1253 = vmatprep.subr.mxu1 %v1460_v61  ;;  %601 = vmatmul.mubr.f32.vlgmr.msra.gmra.mxu0 %v1715_v32  ;;  %v2096_v61 = vand.u32 4294901760, %v1489_v12  ;;  %v2109_v12 = vand.u32 4294901760, %v2108_v11 }
  0xc1   :  { %1207 = vmatprep.subr.mxu0 %v2084_v15  ;;  %1254 = vmatpush3.msra.mxu1 %v1462_v62  ;;  %v2097_v62 = vand.u32 4294901760, %v1497_v19 }
  0xc2   :  { %607 = vmatprep.mubr.f32.mxu0 %v1743_v42  ;;  %1208 = vmatpush3.msra.mxu0 %v2085_v16 }
  0xc3   :  { %1255 = vmatprep.subr.mxu1 %v1465_v1  ;;  %1209 = vmatprep.subr.mxu0 %v2086_v22  ;;  %v2098_v1 = vand.u32 4294901760, %v2063_v51 }
  0xc4   :  { %1256 = vmatpush3.msra.mxu1 %v1467_v2  ;;  %1210 = vmatpush3.msra.mxu0 %v2087_v23  ;;  %v2099_v2 = vand.u32 4294901760, %v2064_v45 }
  0xc5   :  { %1257 = vmatprep.subr.mxu1 %v1469_v3  ;;  %610 = vmatmul.mubr.f32.gmra.mxu0 %v1736_v63  ;;  %v2101_v3 = vand.u32 4294901760, %v2067_v17 }
  0xc6   :  { %1211 = vmatprep.subr.mxu0 %v2088_v27  ;;  %1258 = vmatpush3.msra.mxu1 %v1477_v6 }
  0xc7   :  { %1212 = vmatpush3.msra.mxu0 %v2089_v21  ;;  %1047 = vmatprep.mubr.msk.f32.mxu0 %vm1707_vm9, %v2081_v9 }
  0xc8   :  { %1259 = vmatprep.subr.mxu1 %v1479_v7  ;;  %1213 = vmatprep.subr.mxu0 %v2090_v24  ;;  %v2106_v7 = vld [vmem:[#allocation16_spill] sm:$0xff] }
  0xc9   :  { %1260 = vmatpush3.msra.mxu1 %v1491_v13  ;;  %1214 = vmatpush3.msra.mxu0 %v2091_v25  ;;  %v2107_v8 = vand.u32 4294901760, %v2106_v7  ;;  %v2110_v13 = vld [vmem:[#allocation18_spill] sm:$0xff] }
  0xca   :  { %1261 = vmatprep.subr.mxu1 %v1541_v47  ;;  %1215 = vmatprep.subr.mxu0 %v2092_v26 }
  0xcb   :  { %1262 = vmatpush3.msra.mxu1 %v1543_v18  ;;  %1216 = vmatpush3.msra.mxu0 %v2093_v30  ;;  %v2111_v18 = vand.u32 4294901760, %v2110_v13 }
  0xcc   :  { %1263 = vmatprep.subr.mxu1 %v1545_v49  ;;  %1217 = vmatprep.subr.mxu0 %v2094_v31  ;;  %v2115_v49 = vand.u32 4294901760, %v2077_v41 }
  0xcd   :  { %1264 = vmatpush3.msra.mxu1 %v1547_v50  ;;  %1218 = vmatpush3.msra.mxu0 %v2095_v35  ;;  %v2116_v50 = vand.u32 4294901760, %v2078_v40 }
  0xce   :  { %1265 = vmatprep.subr.mxu1 %v1549_v43  ;;  %1219 = vmatprep.subr.mxu0 %v2096_v61  ;;  %v2100_v43 = vand.u32 4294901760, %v2065_v58 }
  0xcf   :  { %1266 = vmatpush3.msra.mxu1 %v1557_v56  ;;  %1220 = vmatpush3.msra.mxu0 %v2097_v62  ;;  %v2117_v56 = vand.u32 4294901760, %v2079_v0 }
  0xd0   :  { %1267 = vmatprep.subr.mxu1 %v1559_v57  ;;  %1221 = vmatprep.subr.mxu0 %v2098_v1 }
  0xd1   :  { %1268 = vmatpush3.msra.mxu1 %v1571_v52  ;;  %1222 = vmatpush3.msra.mxu0 %v2099_v2  ;;  %v2119_v52 = vand.u32 4294901760, %v1649_v38 }
  0xd2   :  { %1269 = vmatprep.subr.mxu1 %v1621_v34  ;;  %1223 = vmatprep.subr.mxu0 %v2100_v43  ;;  %v2104_v34 = vld [vmem:[#allocation15_spill] sm:$0xff] }
  0xd3   :  { %1270 = vmatpush3.msra.mxu1 %v2066_v46  ;;  %1224 = vmatpush3.msra.mxu0 %v2101_v3  ;;  %v2105_v6 = vand.u32 4294901760, %v2104_v34 }
  0xd4   :  { %1271 = vmatprep.subr.mxu1 %v1625_v37  ;;  %1225 = vmatprep.subr.mxu0 %v2102_v4  ;;  %v2120_v37 = vand.u32 4294901760, %v1657_v39 }
  0xd5   :  { %1272 = vmatpush3.msra.mxu1 %v1627_v53  ;;  %1226 = vmatpush3.msra.mxu0 %v2103_v5  ;;  %v2121_v53 = vand.u32 4294901760, %v1660_v28 }
  0xd6   :  { %1273 = vmatprep.subr.mxu1 %v1629_v36  ;;  %1227 = vmatprep.subr.mxu0 %v2105_v6  ;;  %v2113_v36 = vand.u32 4294901760, %v2075_v29 }
  0xd7   :  { %1274 = vmatpush3.msra.mxu1 %v1637_v59  ;;  %1228 = vmatpush3.msra.mxu0 %v2107_v8  ;;  %v2122_v59 = vand.u32 4294901760, %v2082_v10 }
  0xd8   :  { %1275 = vmatprep.subr.mxu1 %v1639_v60  ;;  %1229 = vmatprep.subr.mxu0 %v2109_v12 }
  0xd9   :  { %1276 = vmatpush3.msra.mxu1 %v1651_v33  ;;  %1230 = vmatpush3.msra.mxu0 %v2111_v18 }
  0xda   :  { %1052 = vmatmul.mubr.msk.f32.vlgmr.msra.gmra.mxu1 %vm1703_vm7, %v2081_v9  ;;  %1231 = vmatprep.subr.mxu0 %v2113_v36 }
  0xdb   :  { %1053 = vmatprep.mubr.msk.f32.mxu1 %vm1725_vm11, %v2081_v9  ;;  %1232 = vmatpush3.msra.mxu0 %v2115_v49 }
  0xdc   :  { %1233 = vmatprep.subr.mxu0 %v2116_v50 }
  0xdd   :  { %1234 = vmatpush3.msra.mxu0 %v2117_v56 }
  0xde   :  { %1054 = vmatmul.mubr.msk.f32.gmra.mxu1 %vm1721_vm10, %v2081_v9  ;;  %1235 = vmatprep.subr.mxu0 %v2119_v52 }
  0xdf   :  { %1236 = vmatpush3.msra.mxu0 %v2120_v37 }
  0xe0   :  { %1237 = vmatprep.subr.mxu0 %v2121_v53 }
  0xe1   :  { %1238 = vmatpush3.msra.mxu0 %v2122_v59 }
  0xe2   :  { %1048 = vmatmul.mubr.msk.f32.vlgmr.msra.gmra.mxu0 %vm1703_vm7, %v2081_v9 }
  0xe3   :  { %1049 = vmatprep.mubr.msk.f32.mxu0 %vm1725_vm11, %v2081_v9 }
  0xe6   :  { %1050 = vmatmul.mubr.msk.f32.gmra.mxu0 %vm1721_vm10, %v2081_v9 }
 0x154   :  { %v1125_v60 = vpop.f32.mrf.mxu1 }
 0x156   :  { %v1126_v38 = vpop.f32.mrf.mxu1 }
 0x157   :  { %v1127_v17 = vadd.f32 %v1126_v38, %v1125_v60 }
 0x158   :  { %v1128_v39 = vpop.f32.mrf.mxu1 }
 0x15a   :  { %v1129_v48 = vpop.f32.mrf.mxu1 }
 0x15b   :  { %v1130_v9 = vadd.f32 %v1129_v48, %v1128_v39 }
 0x15d   :  { %v1087_v33 = vpop.f32.mrf.mxu0 }
 0x15f   :  { %v1088_v28 = vpop.f32.mrf.mxu0 }
 0x160   :  { %v1089_v58 = vadd.f32 %v1088_v28, %v1087_v33 }
 0x162   :  { %v1090_v29 = vpop.f32.mrf.mxu0  ;;  %v458_v54 = vadd.f32 %v1127_v17, %v1089_v58 }
 0x164   :  { %v1091_v41 = vpop.f32.mrf.mxu0 }
 0x165   :  { %v1092_v20 = vadd.f32 %v1091_v41, %v1090_v29 }
 0x167   :  { %v465_v22 = vadd.f32 %v1130_v9, %v1092_v20 }
 0x176   :  { %v1201_v32 = vpop.f32.mrf.mxu1 }
 0x178   :  { %v1202_v63 = vpop.f32.mrf.mxu1 }
 0x179   :  { %v1203_v23 = vadd.f32 %v1202_v63, %v1201_v32 }
 0x17b   :  { %v1204_v40 = vpop.f32.mrf.mxu1 }
 0x17d   :  { %v1205_v51 = vpop.f32.mrf.mxu1 }
 0x17e   :  { %v1206_v31 = vadd.f32 %v1205_v51, %v1204_v40 }
 0x180   :  { %v1163_v42 = vpop.f32.mrf.mxu0 }
 0x182   :  { %v1164_v0 = vpop.f32.mrf.mxu0 }
 0x183   :  { %v1165_v55 = vadd.f32 %v1164_v0, %v1163_v42 }
 0x185   :  { %v1166_v45 = vpop.f32.mrf.mxu0  ;;  %v603_v14 = vadd.f32 %v1165_v55, %v458_v54 }
 0x187   :  { %v1167_v44 = vpop.f32.mrf.mxu0  ;;  %v720_v25 = vadd.f32 %v1203_v23, %v603_v14 }
 0x188   :  { %v1168_v15 = vadd.f32 %v1167_v44, %v1166_v45 }
 0x18a   :  { %v612_v24 = vadd.f32 %v1168_v15, %v465_v22 }
 0x18c   :  { %v731_v43 = vadd.f32 %v1206_v31, %v612_v24 }
 0x19a   :  { %v1277_v46 = vpop.f32.mrf.mxu1 }
 0x19c   :  { %v1278_v10 = vpop.f32.mrf.mxu1 }
 0x19d   :  { %v1279_v35 = vadd.f32 %v1278_v10, %v1277_v46 }
 0x19e   :  { %v1280_v27 = vpop.f32.mrf.mxu1 }
 0x1a0   :  { %v1281_v62 = vpop.f32.mrf.mxu1 }
 0x1a1   :  { %v1282_v4 = vadd.f32 %v1281_v62, %v1280_v27 }
 0x1a2   :  { %v1239_v16 = vpop.f32.mrf.mxu0 }
 0x1a4   :  { %v1240_v21 = vpop.f32.mrf.mxu0 }
 0x1a5   :  { %v1241_v26 = vadd.f32 %v1240_v21, %v1239_v16 }
 0x1a6   :  { %v1242_v30 = vpop.f32.mrf.mxu0 }
 0x1a7   :  { %v899_v61 = vadd.f32 %v1241_v26, %v720_v25 }
 0x1a8   :  { %v1243_v1 = vpop.f32.mrf.mxu0 }
 0x1a9   :  { %v1010_v2 = vadd.f32 %v1279_v35, %v899_v61  ;;  %v1244_v3 = vadd.f32 %v1243_v1, %v1242_v30 }
 0x1ab   :  { %1020 = vst [vmem:[#allocation5] sm:$0xff] %v1010_v2  ;;  %v906_v5 = vadd.f32 %v1244_v3, %v731_v43 }
 0x1ad   :  { %v1017_v34 = vadd.f32 %v1282_v4, %v906_v5 }
 0x1af   :  { %1021 = vst [vmem:[#allocation5 + $0x8] sm:$0xff] %v1017_v34 }
 0x1b0   :  { %1323 = shalt.err (!%p1320_p9)
}
 0x1b1   :  { %1033 = dma.vmem_to_hbm [thread:$0]  %s1028_s1, 256, %s1958_s3, [#allocation4], %s1337_s15, %s1337_s15, %s1338_s16  }
 0x1b2   :  { %1334 = dma.done.wait [#allocation4], 256  }
 0x1b3   :  { %1335 = vsyncadd [#allocation4], 4294967040 }
 0x1b4   :  { %1037 = vsyncpa [#allocation3], 1 }
 0x1b5   :  { %1038 = vsyncpa [#allocation4], 1 }

</bundles_post_ra>
